<compile_context>
chip_gen: v7x
topology: tpu7x:2x2x1
jax: 0.10.0
libtpu: 0.0.40
codegen_flags: <defaults>
</compile_context>

<pallas_src>
import jax
import jax.numpy as jnp
from jax.experimental import pallas as pl
from jax.experimental.pallas import tpu as pltpu


def _mlp_head_kernel(x_ref, w1_ref, b1_ref, w2_ref, b2_ref,
                     w3_ref, b3_ref, w4_ref, b4_ref, o_ref):
    # Fused 4-layer linear head (no nonlinearities in the PyTorch module).
    # Dropout (eval mode) is the identity, so it is elided here.
    # bf16 MXU inputs, f32 accumulation, f32 bias add; re-cast to bf16 between layers.
    h = jnp.dot(x_ref[...], w1_ref[...], preferred_element_type=jnp.float32) + b1_ref[...]
    h = jnp.dot(h.astype(jnp.bfloat16), w2_ref[...],
                preferred_element_type=jnp.float32) + b2_ref[...]
    h = jnp.dot(h.astype(jnp.bfloat16), w3_ref[...],
                preferred_element_type=jnp.float32) + b3_ref[...]
    h = jnp.dot(h.astype(jnp.bfloat16), w4_ref[...],
                preferred_element_type=jnp.float32) + b4_ref[...]
    o_ref[...] = h.astype(o_ref.dtype)


def _round_up(x, m):
    return ((x + m - 1) // m) * m


def bert_head_forward(pooled, params, *, block_b=256):
    """pooled: (B, hidden) BERT pooler output (any float dtype).
    params: (w1,b1,w2,b2,w3,b3,w4,b4) with weights stored (in, out) — i.e. PyTorch
    nn.Linear weight transposed — and biases shaped (1, out).  Returns (B, num_labels) f32."""
    w1, b1, w2, b2, w3, b3, w4, b4 = params
    B, H = pooled.shape
    n384, n192, n96, L = w1.shape[1], w2.shape[1], w3.shape[1], w4.shape[1]

    LANE = 128   # lane width
    SUB = 16     # bf16 sublane packing -> keep batch tiles 16-row aligned

    # ---- lane-pad the narrow dims (96-wide intermediate, num_labels output) to 128 ----
    n96p = _round_up(n96, LANE)
    Lp = _round_up(L, LANE)
    w3p = jnp.pad(w3, ((0, 0), (0, n96p - n96)))
    b3p = jnp.pad(b3, ((0, 0), (0, n96p - n96)))
    w4p = jnp.pad(w4, ((0, n96p - n96), (0, Lp - L)))
    b4p = jnp.pad(b4, ((0, 0), (0, Lp - L)))

    # ---- bf16 weights & activations (f32 accumulation happens inside the kernel) ----
    x_bf16 = pooled.astype(jnp.bfloat16)
    ws = [w.astype(jnp.bfloat16) for w in (w1, w2, w3p, w4p)]
    bs = [b.astype(jnp.float32) for b in (b1, b2, b3p, b4p)]

    # ---- batch tiling: pad-and-slice instead of a hard divisibility assert ----
    tb = min(block_b, _round_up(B, SUB))
    tb = _round_up(tb, SUB)
    Bp = _round_up(B, tb)
    if Bp != B:
        x_bf16 = jnp.pad(x_bf16, ((0, Bp - B), (0, 0)))
    grid = (Bp // tb,)

    row = lambda i: (i, 0)       # activation / output tiles walk the batch axis
    const = lambda i: (0, 0)     # weights & biases: fetched once, VMEM-resident

    # Advisory cost so XLA can overlap this latency-dominated head with neighbouring ops.
    cost = pl.CostEstimate(
        flops=2 * B * (H * n384 + n384 * n192 + n192 * n96 + n96 * L),
        transcendentals=0,
        bytes_accessed=int(
            sum(int(a.size) * a.dtype.itemsize for a in (x_bf16, *ws, *bs)) + Bp * Lp * 4
        ),
    )

    # Splitting the batch grid across v7x's two TensorCores duplicates the dominant
    # weight DMA; only worth it once activation traffic dominates (large batches).
    semantics = ("parallel",) if B >= 2048 else ("arbitrary",)

    def build(weight_mode):
        def wspec(shape):
            if weight_mode is None:
                return pl.BlockSpec(shape, const)
            return pl.BlockSpec(shape, const, pipeline_mode=weight_mode)

        return pl.pallas_call(
            _mlp_head_kernel,
            out_shape=jax.ShapeDtypeStruct((Bp, Lp), jnp.float32),
            grid_spec=pltpu.PrefetchScalarGridSpec(
                num_scalar_prefetch=0,
                grid=grid,
                in_specs=[
                    pl.BlockSpec((tb, H), row),
                    wspec(ws[0].shape), wspec(bs[0].shape),
                    wspec(ws[1].shape), wspec(bs[1].shape),
                    wspec(ws[2].shape), wspec(bs[2].shape),
                    wspec(ws[3].shape), wspec(bs[3].shape),
                ],
                out_specs=pl.BlockSpec((tb, Lp), row),
            ),
            compiler_params=pltpu.CompilerParams(dimension_semantics=semantics),
            cost_estimate=cost,
        )

    args = (x_bf16, ws[0], bs[0], ws[1], bs[1], ws[2], bs[2], ws[3], bs[3])
    try:
        # Constant-index weights need no double buffer -> halve weight-resident VMEM.
        out = build(pl.Buffered(1))(*args)
    except Exception:
        # Fallback if this JAX build rejects single-buffered pipeline_mode.
        out = build(None)(*args)

    return out[:B, :L]


if __name__ == "__main__":
    # Small shapes consistent with the module: BERT-base hidden=768 (linear_384/192/96 are
    # hidden//2, //4, //8), small batch, binary labels.
    B = 8
    HIDDEN = 768
    NUM_LABELS = 2
    n384, n192, n96 = HIDDEN // 2, HIDDEN // 4, HIDDEN // 8

    key = jax.random.PRNGKey(0)
    keys = jax.random.split(key, 9)

    # TODO(synk): the pretrained BertModel backbone (embeddings + transformer layers +
    # pooler) is not translatable here; simulate its pooler_output deterministically.
    pooled = jax.random.normal(keys[0], (B, HIDDEN), dtype=jnp.float32)

    def make_linear(kw, kb, fan_in, fan_out):
        w = jax.random.normal(kw, (fan_in, fan_out), dtype=jnp.float32) / jnp.sqrt(
            jnp.float32(fan_in)
        )
        b = 0.01 * jax.random.normal(kb, (1, fan_out), dtype=jnp.float32)
        return w, b

    w1, b1 = make_linear(keys[1], keys[2], HIDDEN, n384)
    w2, b2 = make_linear(keys[3], keys[4], n384, n192)
    w3, b3 = make_linear(keys[5], keys[6], n192, n96)
    w4, b4 = make_linear(keys[7], keys[8], n96, NUM_LABELS)
    params = (w1, b1, w2, b2, w3, b3, w4, b4)

    logits = bert_head_forward(pooled, params)
    logits = jax.block_until_ready(logits)
    assert logits.shape == (B, NUM_LABELS)

    layers = ((w1, b1), (w2, b2), (w3, b3), (w4, b4))

    # Precision-matched reference: bf16 matmul inputs, f32 accumulation (same as kernel).
    h = pooled.astype(jnp.bfloat16)
    ref_bf16 = None
    for w, b in layers:
        ref_bf16 = jnp.dot(h, w.astype(jnp.bfloat16),
                           preferred_element_type=jnp.float32) + b
        h = ref_bf16.astype(jnp.bfloat16)
    assert jnp.allclose(logits, ref_bf16, atol=2e-3, rtol=2e-3), "mismatch vs bf16 reference"

    # Full-f32 reference for the original module semantics (looser tolerance for bf16 inputs).
    ref_f32 = pooled
    for w, b in layers:
        ref_f32 = jnp.dot(ref_f32, w, preferred_element_type=jnp.float32) + b
    assert jnp.allclose(logits, ref_f32, atol=5e-2, rtol=5e-2), "mismatch vs f32 reference"

    print("KERNEL_OK")
</pallas_src>

<mosaic_0001>
module attributes {stable_mosaic.version = 11 : i64} {
  func.func @_mlp_head_kernel(%arg0: i32, %arg1: memref<16x768xbf16, #tpu.memory_space<vmem>>, %arg2: memref<768x384xbf16, #tpu.memory_space<vmem>>, %arg3: memref<1x384xf32, #tpu.memory_space<vmem>>, %arg4: memref<384x192xbf16, #tpu.memory_space<vmem>>, %arg5: memref<1x192xf32, #tpu.memory_space<vmem>>, %arg6: memref<192x128xbf16, #tpu.memory_space<vmem>>, %arg7: memref<1x128xf32, #tpu.memory_space<vmem>>, %arg8: memref<128x128xbf16, #tpu.memory_space<vmem>>, %arg9: memref<1x128xf32, #tpu.memory_space<vmem>>, %arg10: memref<16x128xf32, #tpu.memory_space<vmem>>) attributes {dimension_semantics = [#tpu.dimension_semantics<arbitrary>], iteration_bounds = array<i64: 1>, scalar_prefetch = 0 : i64, scratch_operands = 0 : i64, tpu.core_type = #tpu.core_type<tc>, window_params = [{transform_indices = @transform_0, window_bounds = array<i64: 16, 768>}, {pipeline_mode = #tpu.pipeline_mode<synchronous>, transform_indices = @transform_1, window_bounds = array<i64: 768, 384>}, {pipeline_mode = #tpu.pipeline_mode<synchronous>, transform_indices = @transform_2, window_bounds = array<i64: 1, 384>}, {pipeline_mode = #tpu.pipeline_mode<synchronous>, transform_indices = @transform_3, window_bounds = array<i64: 384, 192>}, {pipeline_mode = #tpu.pipeline_mode<synchronous>, transform_indices = @transform_4, window_bounds = array<i64: 1, 192>}, {pipeline_mode = #tpu.pipeline_mode<synchronous>, transform_indices = @transform_5, window_bounds = array<i64: 192, 128>}, {pipeline_mode = #tpu.pipeline_mode<synchronous>, transform_indices = @transform_6, window_bounds = array<i64: 1, 128>}, {pipeline_mode = #tpu.pipeline_mode<synchronous>, transform_indices = @transform_7, window_bounds = array<i64: 128, 128>}, {pipeline_mode = #tpu.pipeline_mode<synchronous>, transform_indices = @transform_8, window_bounds = array<i64: 1, 128>}, {transform_indices = @transform_9, window_bounds = array<i64: 16, 128>}]} {
    %c0 = arith.constant 0 : index
    %c0_0 = arith.constant 0 : index
    %0 = vector.load %arg1[%c0, %c0_0] : memref<16x768xbf16, #tpu.memory_space<vmem>>, vector<16x768xbf16>
    %c0_1 = arith.constant 0 : index
    %c0_2 = arith.constant 0 : index
    %1 = vector.load %arg2[%c0_1, %c0_2] : memref<768x384xbf16, #tpu.memory_space<vmem>>, vector<768x384xbf16>
    %cst = arith.constant dense<0.000000e+00> : vector<16x384xf32>
    %2 = tpu.matmul %0, %1, %cst {dimension_numbers = #tpu.dot_dimension_numbers<[1], [0], [0], [1], [0, 0, 1, 1], [], []>} : vector<16x768xbf16>, vector<768x384xbf16>, vector<16x384xf32> -> vector<16x384xf32>
    %c0_3 = arith.constant 0 : index
    %c0_4 = arith.constant 0 : index
    %3 = vector.load %arg3[%c0_3, %c0_4] : memref<1x384xf32, #tpu.memory_space<vmem>>, vector<1x384xf32>
    %4 = vector.broadcast %3 : vector<1x384xf32> to vector<16x384xf32>
    %5 = arith.addf %2, %4 : vector<16x384xf32>
    %6 = arith.truncf %5 : vector<16x384xf32> to vector<16x384xbf16>
    %c0_5 = arith.constant 0 : index
    %c0_6 = arith.constant 0 : index
    %7 = vector.load %arg4[%c0_5, %c0_6] : memref<384x192xbf16, #tpu.memory_space<vmem>>, vector<384x192xbf16>
    %cst_7 = arith.constant dense<0.000000e+00> : vector<16x192xf32>
    %8 = tpu.matmul %6, %7, %cst_7 {dimension_numbers = #tpu.dot_dimension_numbers<[1], [0], [0], [1], [0, 0, 1, 1], [], []>} : vector<16x384xbf16>, vector<384x192xbf16>, vector<16x192xf32> -> vector<16x192xf32>
    %c0_8 = arith.constant 0 : index
    %c0_9 = arith.constant 0 : index
    %9 = vector.load %arg5[%c0_8, %c0_9] : memref<1x192xf32, #tpu.memory_space<vmem>>, vector<1x192xf32>
    %10 = vector.broadcast %9 : vector<1x192xf32> to vector<16x192xf32>
    %11 = arith.addf %8, %10 : vector<16x192xf32>
    %12 = arith.truncf %11 : vector<16x192xf32> to vector<16x192xbf16>
    %c0_10 = arith.constant 0 : index
    %c0_11 = arith.constant 0 : index
    %13 = vector.load %arg6[%c0_10, %c0_11] : memref<192x128xbf16, #tpu.memory_space<vmem>>, vector<192x128xbf16>
    %cst_12 = arith.constant dense<0.000000e+00> : vector<16x128xf32>
    %14 = tpu.matmul %12, %13, %cst_12 {dimension_numbers = #tpu.dot_dimension_numbers<[1], [0], [0], [1], [0, 0, 1, 1], [], []>} : vector<16x192xbf16>, vector<192x128xbf16>, vector<16x128xf32> -> vector<16x128xf32>
    %c0_13 = arith.constant 0 : index
    %c0_14 = arith.constant 0 : index
    %15 = vector.load %arg7[%c0_13, %c0_14] : memref<1x128xf32, #tpu.memory_space<vmem>>, vector<1x128xf32>
    %16 = vector.broadcast %15 : vector<1x128xf32> to vector<16x128xf32>
    %17 = arith.addf %14, %16 : vector<16x128xf32>
    %18 = arith.truncf %17 : vector<16x128xf32> to vector<16x128xbf16>
    %c0_15 = arith.constant 0 : index
    %c0_16 = arith.constant 0 : index
    %19 = vector.load %arg8[%c0_15, %c0_16] : memref<128x128xbf16, #tpu.memory_space<vmem>>, vector<128x128xbf16>
    %cst_17 = arith.constant dense<0.000000e+00> : vector<16x128xf32>
    %20 = tpu.matmul %18, %19, %cst_17 {dimension_numbers = #tpu.dot_dimension_numbers<[1], [0], [0], [1], [0, 0, 1, 1], [], []>} : vector<16x128xbf16>, vector<128x128xbf16>, vector<16x128xf32> -> vector<16x128xf32>
    %c0_18 = arith.constant 0 : index
    %c0_19 = arith.constant 0 : index
    %21 = vector.load %arg9[%c0_18, %c0_19] : memref<1x128xf32, #tpu.memory_space<vmem>>, vector<1x128xf32>
    %22 = vector.broadcast %21 : vector<1x128xf32> to vector<16x128xf32>
    %23 = arith.addf %20, %22 : vector<16x128xf32>
    %c0_20 = arith.constant 0 : index
    %c0_21 = arith.constant 0 : index
    %24 = vector.load %arg10[%c0_20, %c0_21] : memref<16x128xf32, #tpu.memory_space<vmem>>, vector<16x128xf32>
    tpu.vector_store %arg10[%c0_20, %c0_21], %23 {strides = array<i32>} : memref<16x128xf32, #tpu.memory_space<vmem>>, vector<16x128xf32>,
    return
  }
  func.func @transform_0(%arg0: i32) -> (i32, i32) {
    %c0_i32 = arith.constant 0 : i32
    %c0_i32_0 = arith.constant 0 : i32
    return %arg0, %c0_i32 : i32, i32
  }
  func.func @transform_1(%arg0: i32) -> (i32, i32) {
    %c0_i32 = arith.constant 0 : i32
    %c0_i32_0 = arith.constant 0 : i32
    %c0_i32_1 = arith.constant 0 : i32
    return %c0_i32, %c0_i32_0 : i32, i32
  }
  func.func @transform_2(%arg0: i32) -> (i32, i32) {
    %c0_i32 = arith.constant 0 : i32
    %c0_i32_0 = arith.constant 0 : i32
    %c0_i32_1 = arith.constant 0 : i32
    return %c0_i32, %c0_i32_0 : i32, i32
  }
  func.func @transform_3(%arg0: i32) -> (i32, i32) {
    %c0_i32 = arith.constant 0 : i32
    %c0_i32_0 = arith.constant 0 : i32
    %c0_i32_1 = arith.constant 0 : i32
    return %c0_i32, %c0_i32_0 : i32, i32
  }
  func.func @transform_4(%arg0: i32) -> (i32, i32) {
    %c0_i32 = arith.constant 0 : i32
    %c0_i32_0 = arith.constant 0 : i32
    %c0_i32_1 = arith.constant 0 : i32
    return %c0_i32, %c0_i32_0 : i32, i32
  }
  func.func @transform_5(%arg0: i32) -> (i32, i32) {
    %c0_i32 = arith.constant 0 : i32
    %c0_i32_0 = arith.constant 0 : i32
    %c0_i32_1 = arith.constant 0 : i32
    return %c0_i32, %c0_i32_0 : i32, i32
  }
  func.func @transform_6(%arg0: i32) -> (i32, i32) {
    %c0_i32 = arith.constant 0 : i32
    %c0_i32_0 = arith.constant 0 : i32
    %c0_i32_1 = arith.constant 0 : i32
    return %c0_i32, %c0_i32_0 : i32, i32
  }
  func.func @transform_7(%arg0: i32) -> (i32, i32) {
    %c0_i32 = arith.constant 0 : i32
    %c0_i32_0 = arith.constant 0 : i32
    %c0_i32_1 = arith.constant 0 : i32
    return %c0_i32, %c0_i32_0 : i32, i32
  }
  func.func @transform_8(%arg0: i32) -> (i32, i32) {
    %c0_i32 = arith.constant 0 : i32
    %c0_i32_0 = arith.constant 0 : i32
    %c0_i32_1 = arith.constant 0 : i32
    return %c0_i32, %c0_i32_0 : i32, i32
  }
  func.func @transform_9(%arg0: i32) -> (i32, i32) {
    %c0_i32 = arith.constant 0 : i32
    %c0_i32_0 = arith.constant 0 : i32
    return %arg0, %c0_i32 : i32, i32
  }
}

module attributes {stable_mosaic.version = 11 : i64} {
  func.func @_mlp_head_kernel(%arg0: i32, %arg1: memref<16x768xbf16, #tpu.memory_space<vmem>>, %arg2: memref<768x384xbf16, #tpu.memory_space<vmem>>, %arg3: memref<1x384xf32, #tpu.memory_space<vmem>>, %arg4: memref<384x192xbf16, #tpu.memory_space<vmem>>, %arg5: memref<1x192xf32, #tpu.memory_space<vmem>>, %arg6: memref<192x128xbf16, #tpu.memory_space<vmem>>, %arg7: memref<1x128xf32, #tpu.memory_space<vmem>>, %arg8: memref<128x128xbf16, #tpu.memory_space<vmem>>, %arg9: memref<1x128xf32, #tpu.memory_space<vmem>>, %arg10: memref<16x128xf32, #tpu.memory_space<vmem>>) attributes {dimension_semantics = [#tpu.dimension_semantics<arbitrary>], iteration_bounds = array<i64: 1>, scalar_prefetch = 0 : i64, scratch_operands = 0 : i64, tpu.core_type = #tpu.core_type<tc>, window_params = [{transform_indices = @transform_0, window_bounds = array<i64: 16, 768>}, {pipeline_mode = #tpu.pipeline_mode<synchronous>, transform_indices = @transform_1, window_bounds = array<i64: 768, 384>}, {pipeline_mode = #tpu.pipeline_mode<synchronous>, transform_indices = @transform_2, window_bounds = array<i64: 1, 384>}, {pipeline_mode = #tpu.pipeline_mode<synchronous>, transform_indices = @transform_3, window_bounds = array<i64: 384, 192>}, {pipeline_mode = #tpu.pipeline_mode<synchronous>, transform_indices = @transform_4, window_bounds = array<i64: 1, 192>}, {pipeline_mode = #tpu.pipeline_mode<synchronous>, transform_indices = @transform_5, window_bounds = array<i64: 192, 128>}, {pipeline_mode = #tpu.pipeline_mode<synchronous>, transform_indices = @transform_6, window_bounds = array<i64: 1, 128>}, {pipeline_mode = #tpu.pipeline_mode<synchronous>, transform_indices = @transform_7, window_bounds = array<i64: 128, 128>}, {pipeline_mode = #tpu.pipeline_mode<synchronous>, transform_indices = @transform_8, window_bounds = array<i64: 1, 128>}, {transform_indices = @transform_9, window_bounds = array<i64: 16, 128>}]} {
    %c0 = arith.constant 0 : index
    %c0_0 = arith.constant 0 : index
    %0 = vector.load %arg1[%c0, %c0_0] : memref<16x768xbf16, #tpu.memory_space<vmem>>, vector<16x768xbf16>
    %c0_1 = arith.constant 0 : index
    %c0_2 = arith.constant 0 : index
    %1 = vector.load %arg2[%c0_1, %c0_2] : memref<768x384xbf16, #tpu.memory_space<vmem>>, vector<768x384xbf16>
    %cst = arith.constant dense<0.000000e+00> : vector<16x384xf32>
    %2 = tpu.matmul %0, %1, %cst {dimension_numbers = #tpu.dot_dimension_numbers<[1], [0], [0], [1], [0, 0, 1, 1], [], []>} : vector<16x768xbf16>, vector<768x384xbf16>, vector<16x384xf32> -> vector<16x384xf32>
    %c0_3 = arith.constant 0 : index
    %c0_4 = arith.constant 0 : index
    %3 = vector.load %arg3[%c0_3, %c0_4] : memref<1x384xf32, #tpu.memory_space<vmem>>, vector<1x384xf32>
    %4 = vector.broadcast %3 : vector<1x384xf32> to vector<16x384xf32>
    %5 = arith.addf %2, %4 : vector<16x384xf32>
    %6 = arith.truncf %5 : vector<16x384xf32> to vector<16x384xbf16>
    %c0_5 = arith.constant 0 : index
    %c0_6 = arith.constant 0 : index
    %7 = vector.load %arg4[%c0_5, %c0_6] : memref<384x192xbf16, #tpu.memory_space<vmem>>, vector<384x192xbf16>
    %cst_7 = arith.constant dense<0.000000e+00> : vector<16x192xf32>
    %8 = tpu.matmul %6, %7, %cst_7 {dimension_numbers = #tpu.dot_dimension_numbers<[1], [0], [0], [1], [0, 0, 1, 1], [], []>} : vector<16x384xbf16>, vector<384x192xbf16>, vector<16x192xf32> -> vector<16x192xf32>
    %c0_8 = arith.constant 0 : index
    %c0_9 = arith.constant 0 : index
    %9 = vector.load %arg5[%c0_8, %c0_9] : memref<1x192xf32, #tpu.memory_space<vmem>>, vector<1x192xf32>
    %10 = vector.broadcast %9 : vector<1x192xf32> to vector<16x192xf32>
    %11 = arith.addf %8, %10 : vector<16x192xf32>
    %12 = arith.truncf %11 : vector<16x192xf32> to vector<16x192xbf16>
    %c0_10 = arith.constant 0 : index
    %c0_11 = arith.constant 0 : index
    %13 = vector.load %arg6[%c0_10, %c0_11] : memref<192x128xbf16, #tpu.memory_space<vmem>>, vector<192x128xbf16>
    %cst_12 = arith.constant dense<0.000000e+00> : vector<16x128xf32>
    %14 = tpu.matmul %12, %13, %cst_12 {dimension_numbers = #tpu.dot_dimension_numbers<[1], [0], [0], [1], [0, 0, 1, 1], [], []>} : vector<16x192xbf16>, vector<192x128xbf16>, vector<16x128xf32> -> vector<16x128xf32>
    %c0_13 = arith.constant 0 : index
    %c0_14 = arith.constant 0 : index
    %15 = vector.load %arg7[%c0_13, %c0_14] : memref<1x128xf32, #tpu.memory_space<vmem>>, vector<1x128xf32>
    %16 = vector.broadcast %15 : vector<1x128xf32> to vector<16x128xf32>
    %17 = arith.addf %14, %16 : vector<16x128xf32>
    %18 = arith.truncf %17 : vector<16x128xf32> to vector<16x128xbf16>
    %c0_15 = arith.constant 0 : index
    %c0_16 = arith.constant 0 : index
    %19 = vector.load %arg8[%c0_15, %c0_16] : memref<128x128xbf16, #tpu.memory_space<vmem>>, vector<128x128xbf16>
    %cst_17 = arith.constant dense<0.000000e+00> : vector<16x128xf32>
    %20 = tpu.matmul %18, %19, %cst_17 {dimension_numbers = #tpu.dot_dimension_numbers<[1], [0], [0], [1], [0, 0, 1, 1], [], []>} : vector<16x128xbf16>, vector<128x128xbf16>, vector<16x128xf32> -> vector<16x128xf32>
    %c0_18 = arith.constant 0 : index
    %c0_19 = arith.constant 0 : index
    %21 = vector.load %arg9[%c0_18, %c0_19] : memref<1x128xf32, #tpu.memory_space<vmem>>, vector<1x128xf32>
    %22 = vector.broadcast %21 : vector<1x128xf32> to vector<16x128xf32>
    %23 = arith.addf %20, %22 : vector<16x128xf32>
    %c0_20 = arith.constant 0 : index
    %c0_21 = arith.constant 0 : index
    %24 = vector.load %arg10[%c0_20, %c0_21] : memref<16x128xf32, #tpu.memory_space<vmem>>, vector<16x128xf32>
    tpu.vector_store %arg10[%c0_20, %c0_21], %23 {strides = array<i32>} : memref<16x128xf32, #tpu.memory_space<vmem>>, vector<16x128xf32>,
    return
  }
  func.func @transform_0(%arg0: i32) -> (i32, i32) {
    %c0_i32 = arith.constant 0 : i32
    %c0_i32_0 = arith.constant 0 : i32
    return %arg0, %c0_i32 : i32, i32
  }
  func.func @transform_1(%arg0: i32) -> (i32, i32) {
    %c0_i32 = arith.constant 0 : i32
    %c0_i32_0 = arith.constant 0 : i32
    %c0_i32_1 = arith.constant 0 : i32
    return %c0_i32, %c0_i32_0 : i32, i32
  }
  func.func @transform_2(%arg0: i32) -> (i32, i32) {
    %c0_i32 = arith.constant 0 : i32
    %c0_i32_0 = arith.constant 0 : i32
    %c0_i32_1 = arith.constant 0 : i32
    return %c0_i32, %c0_i32_0 : i32, i32
  }
  func.func @transform_3(%arg0: i32) -> (i32, i32) {
    %c0_i32 = arith.constant 0 : i32
    %c0_i32_0 = arith.constant 0 : i32
    %c0_i32_1 = arith.constant 0 : i32
    return %c0_i32, %c0_i32_0 : i32, i32
  }
  func.func @transform_4(%arg0: i32) -> (i32, i32) {
    %c0_i32 = arith.constant 0 : i32
    %c0_i32_0 = arith.constant 0 : i32
    %c0_i32_1 = arith.constant 0 : i32
    return %c0_i32, %c0_i32_0 : i32, i32
  }
  func.func @transform_5(%arg0: i32) -> (i32, i32) {
    %c0_i32 = arith.constant 0 : i32
    %c0_i32_0 = arith.constant 0 : i32
    %c0_i32_1 = arith.constant 0 : i32
    return %c0_i32, %c0_i32_0 : i32, i32
  }
  func.func @transform_6(%arg0: i32) -> (i32, i32) {
    %c0_i32 = arith.constant 0 : i32
    %c0_i32_0 = arith.constant 0 : i32
    %c0_i32_1 = arith.constant 0 : i32
    return %c0_i32, %c0_i32_0 : i32, i32
  }
  func.func @transform_7(%arg0: i32) -> (i32, i32) {
    %c0_i32 = arith.constant 0 : i32
    %c0_i32_0 = arith.constant 0 : i32
    %c0_i32_1 = arith.constant 0 : i32
    return %c0_i32, %c0_i32_0 : i32, i32
  }
  func.func @transform_8(%arg0: i32) -> (i32, i32) {
    %c0_i32 = arith.constant 0 : i32
    %c0_i32_0 = arith.constant 0 : i32
    %c0_i32_1 = arith.constant 0 : i32
    return %c0_i32, %c0_i32_0 : i32, i32
  }
  func.func @transform_9(%arg0: i32) -> (i32, i32) {
    %c0_i32 = arith.constant 0 : i32
    %c0_i32_0 = arith.constant 0 : i32
    return %arg0, %c0_i32 : i32, i32
  }
}

</mosaic_0001>

<bundles_post_ra>
// kernel: tpu_custom_call.1
= control target key start
LH: loop header
LB: loop body
LE: loop exit
PB: predicated region body
PF: predicated region fallthrough
CT: control target
= control target key end

     0   :  { %14 = vsyncpa [#allocation3], 0  ;;  %s3027_s0 = inlined_call_operand.vmem [shape: bf16[16,768], index: 0, kind: input, shape index: {}]   ;;  %s3028_s1 = inlined_call_operand.hbm [shape: bf16[768,384], index: 1, kind: input, shape index: {}]   ;;  %s3029_s2 = inlined_call_operand.vmem [shape: f32[1,384], index: 2, kind: input, shape index: {}]   ;;  %s3030_s3 = inlined_call_operand.vmem [shape: bf16[384,192], index: 3, kind: input, shape index: {}]   ;;  %s3031_s4 = inlined_call_operand.vmem [shape: f32[1,192], index: 4, kind: input, shape index: {}]   ;;  %s3032_s5 = inlined_call_operand.vmem [shape: bf16[192,128], index: 5, kind: input, shape index: {}]   ;;  %s3033_s6 = inlined_call_operand.vmem [shape: f32[1,128], index: 6, kind: input, shape index: {}]   ;;  %s3034_s7 = inlined_call_operand.vmem [shape: bf16[128,128], index: 7, kind: input, shape index: {}]   ;;  %s3035_s8 = inlined_call_operand.vmem [shape: f32[1,128], index: 8, kind: input, shape index: {}]   ;;  %s3036_s9 = inlined_call_operand.hbm [shape: f32[16,128], index: 9, kind: output, shape index: {}]  }
   0x1   :  { %15 = vsyncpa [#allocation4], 0  ;;  %s2670_s30 = smov [#allocation2]   ;;  %s2622_s13 = scalar_lea.hbm %s3028_s1, 18432 }
   0x2   :  { %s23_s10 = sshll.u32 %s2670_s30, 4  ;;  %p2623_p0 = scmp.ne.s32.totalorder %s3028_s1, %s2622_s13  ;;  %s24_s10 = int_to_ptr.vmem [resolvable:$true] %s23_s10 }
   0x3   :  { %p2626_p1 = scmp.lt.u32.totalorder %s2622_s13, %s3028_s1 }
   0x5   :  { %p2628_p2 = pnand %p2626_p1, %p2623_p0 }
   0x7   :  { %2631 = shalt.err (!%p2628_p2)
}
   0x8   :  { %s2632_s18 = scalar_lea.vmem %s24_s10, 18432  ;;  %p2637_p4 = scmp.lt.s32.totalorder %s24_s10, %s24_s10 }
   0x9   :  { %p2633_p3 = scmp.ne.s32.totalorder %s24_s10, %s2632_s18  ;;  %p2638_p5 = scmp.lt.s32.totalorder %s2632_s18, %s2632_s18 }
   0xb   :  { %p2639_p6 = por %p2638_p5, %p2637_p4 }
   0xd   :  { %p2640_p7 = pnand %p2639_p6, %p2633_p3 }
   0xf   :  { %2643 = shalt.err (!%p2640_p7)
}
  0x10   :  { %s2671_s19 = smov 192   ;;  %s2672_s20 = smov 12  }
  0x11   :  { %29 = dma.hbm_to_vmem [thread:$0]  %s3028_s1, 18432, %s24_s10, [#allocation3], %s2671_s19, %s2671_s19, %s2672_s20  }
  0x12   :  { %2666 = dma.done.wait [#allocation3], 18432  }
  0x13   :  { %2667 = vsyncadd [#allocation3], 4294948864  ;;  %v2329_v0 = vld [vmem:[#allocation2 + $0x4] ss:$12 sps:$4 sm:$0xff]   ;;  %v2331_v1 = vld [vmem:[#allocation2] ss:$12 sps:$4 sm:$0xff]  }
  0x14   :  { %1061 = vmatprep.subr.bf16.mxu0 %v2329_v0  ;;  %v2332_v2 = vld [vmem:[#allocation2 + $0x1c] ss:$12 sps:$4 sm:$0xff]   ;;  %v2334_v3 = vld [vmem:[#allocation2 + $0x18] ss:$12 sps:$4 sm:$0xff]   ;;  %v2335_v4 = vld [vmem:[#allocation2 + $0x34] ss:$12 sps:$4 sm:$0xff]  }
  0x15   :  { %1062 = vmatpush1.bf16.msra.mxu0 %v2331_v1  ;;  %v2337_v5 = vld [vmem:[#allocation2 + $0x30] ss:$12 sps:$4 sm:$0xff]   ;;  %v2338_v6 = vld [vmem:[#allocation2 + $0x4c] ss:$12 sps:$4 sm:$0xff]   ;;  %v2340_v7 = vld [vmem:[#allocation2 + $0x48] ss:$12 sps:$4 sm:$0xff]  }
  0x16   :  { %1063 = vmatprep.subr.bf16.mxu0 %v2332_v2  ;;  %v2341_v8 = vld [vmem:[#allocation2 + $0x64] ss:$12 sps:$4 sm:$0xff]   ;;  %v2343_v9 = vld [vmem:[#allocation2 + $0x60] ss:$12 sps:$4 sm:$0xff]   ;;  %v2344_v10 = vld [vmem:[#allocation2 + $0x7c] ss:$12 sps:$4 sm:$0xff]  }
  0x17   :  { %v2346_v11 = vld [vmem:[#allocation2 + $0x78] ss:$12 sps:$4 sm:$0xff]   ;;  %v2347_v12 = vld [vmem:[#allocation2 + $0x94] ss:$12 sps:$4 sm:$0xff]   ;;  %v2349_v14 = vld [vmem:[#allocation2 + $0x90] ss:$12 sps:$4 sm:$0xff]  }
  0x18   :  { %v2379_v13 = vld [vmem:[%s3027_s0 + $0x4] ss:$24 sps:$4 sm:$0xff]   ;;  %v2350_v15 = vld [vmem:[#allocation2 + $0xac] ss:$12 sps:$4 sm:$0xff]   ;;  %v2383_v16 = vld [vmem:[#allocation2 + $0xc8] ss:$12 sps:$4 sm:$0xff]  }
  0x19   :  { %1064 = vmatpush1.bf16.msra.mxu0 %v2334_v3  ;;  %1093 = vmatprep.mubr.bf16.mxu0 %v2379_v13  ;;  %v2384_v17 = vld [vmem:[#allocation2 + $0x8] ss:$12 sps:$4 sm:$0xff]   ;;  %v2353_v19 = vld [vmem:[#allocation2 + $0xc4] ss:$12 sps:$4 sm:$0xff]   ;;  %v2388_v20 = vld [vmem:[#allocation2 + $0xe0] ss:$12 sps:$4 sm:$0xff]  }
  0x1a   :  { %1065 = vmatprep.subr.bf16.mxu0 %v2335_v4  ;;  %1222 = vmatprep.mubr.bf16.mxu1 %v2379_v13  ;;  %v2352_v18 = vld [vmem:[#allocation2 + $0xa8] ss:$12 sps:$4 sm:$0xff]   ;;  %v2389_v21 = vld [vmem:[#allocation2 + $0x20] ss:$12 sps:$4 sm:$0xff]   ;;  %v2393_v24 = vld [vmem:[#allocation2 + $0xf8] ss:$12 sps:$4 sm:$0xff]  }
  0x1b   :  { %2205 = vmatprep.subr.bf16.mxu1 %v2383_v16  ;;  %v2355_v22 = vld [vmem:[#allocation2 + $0xc0] ss:$12 sps:$4 sm:$0xff]   ;;  %v2356_v23 = vld [vmem:[#allocation2 + $0xdc] ss:$12 sps:$4 sm:$0xff]   ;;  %v2394_v25 = vld [vmem:[#allocation2 + $0x38] ss:$12 sps:$4 sm:$0xff]  }
  0x1c   :  { %2206 = vmatpush3.bf16.msra.mxu1 %v2384_v17  ;;  %v2358_v26 = vld [vmem:[#allocation2 + $0xd8] ss:$12 sps:$4 sm:$0xff]   ;;  %v2398_v27 = vld [vmem:[#allocation2 + $0x110] ss:$12 sps:$4 sm:$0xff]   ;;  %v2359_v29 = vld [vmem:[#allocation2 + $0xf4] ss:$12 sps:$4 sm:$0xff]  }
  0x1d   :  { %1066 = vmatpush1.bf16.msra.mxu0 %v2337_v5  ;;  %2207 = vmatprep.subr.bf16.mxu1 %v2388_v20  ;;  %v2399_v28 = vld [vmem:[#allocation2 + $0x50] ss:$12 sps:$4 sm:$0xff]   ;;  %v2403_v31 = vld [vmem:[#allocation2 + $0x128] ss:$12 sps:$4 sm:$0xff]   ;;  %v2362_v33 = vld [vmem:[#allocation2 + $0x10c] ss:$12 sps:$4 sm:$0xff]  }
  0x1e   :  { %1067 = vmatprep.subr.bf16.mxu0 %v2338_v6  ;;  %v2361_v30 = vld [vmem:[#allocation2 + $0xf0] ss:$12 sps:$4 sm:$0xff]   ;;  %v2404_v32 = vld [vmem:[#allocation2 + $0x68] ss:$12 sps:$4 sm:$0xff]   ;;  %v2408_v34 = vld [vmem:[#allocation2 + $0x140] ss:$12 sps:$4 sm:$0xff]  }
  0x1f   :  { %v2364_v35 = vld [vmem:[#allocation2 + $0x108] ss:$12 sps:$4 sm:$0xff]   ;;  %v2365_v36 = vld [vmem:[#allocation2 + $0x124] ss:$12 sps:$4 sm:$0xff]   ;;  %v2409_v37 = vld [vmem:[#allocation2 + $0x80] ss:$12 sps:$4 sm:$0xff]  }
  0x20   :  { %2208 = vmatpush3.bf16.msra.mxu1 %v2389_v21  ;;  %v2413_v38 = vld [vmem:[#allocation2 + $0x158] ss:$12 sps:$4 sm:$0xff]   ;;  %v2367_v39 = vld [vmem:[#allocation2 + $0x120] ss:$12 sps:$4 sm:$0xff]   ;;  %v2368_v40 = vld [vmem:[#allocation2 + $0x13c] ss:$12 sps:$4 sm:$0xff]  }
  0x21   :  { %1068 = vmatpush1.bf16.msra.mxu0 %v2340_v7  ;;  %2209 = vmatprep.subr.bf16.mxu1 %v2393_v24  ;;  %v2414_v41 = vld [vmem:[#allocation2 + $0x98] ss:$12 sps:$4 sm:$0xff]   ;;  %v2418_v42 = vld [vmem:[#allocation2 + $0x170] ss:$12 sps:$4 sm:$0xff]   ;;  %v2371_v44 = vld [vmem:[#allocation2 + $0x154] ss:$12 sps:$4 sm:$0xff]  }
  0x22   :  { %1069 = vmatprep.subr.bf16.mxu0 %v2341_v8  ;;  %v2370_v43 = vld [vmem:[#allocation2 + $0x138] ss:$12 sps:$4 sm:$0xff]   ;;  %v2419_v45 = vld [vmem:[#allocation2 + $0xb0] ss:$12 sps:$4 sm:$0xff]   ;;  %v2423_v46 = vld [vmem:[#allocation2 + $0x248] ss:$12 sps:$4 sm:$0xff]  }
  0x23   :  { %v2373_v47 = vld [vmem:[#allocation2 + $0x150] ss:$12 sps:$4 sm:$0xff]   ;;  %v2374_v48 = vld [vmem:[#allocation2 + $0x16c] ss:$12 sps:$4 sm:$0xff]   ;;  %v2424_v50 = vld [vmem:[#allocation2 + $0x188] ss:$12 sps:$4 sm:$0xff]  }
  0x24   :  { %2210 = vmatpush3.bf16.msra.mxu1 %v2394_v25  ;;  %v2377_v49 = vld [vmem:[%s3027_s0] ss:$24 sps:$4 sm:$0xff]   ;;  %v2376_v52 = vld [vmem:[#allocation2 + $0x168] ss:$12 sps:$4 sm:$0xff]   ;;  %v2382_v54 = vld [vmem:[#allocation2 + $0x184] ss:$12 sps:$4 sm:$0xff]  }
  0x25   :  { %1070 = vmatpush1.bf16.msra.mxu0 %v2343_v9  ;;  %2211 = vmatprep.subr.bf16.mxu1 %v2398_v27  ;;  %v2428_v51 = vld [vmem:[#allocation2 + $0x260] ss:$12 sps:$4 sm:$0xff]   ;;  %v2433_v55 = vld [vmem:[#allocation2 + $0x278] ss:$12 sps:$4 sm:$0xff]   ;;  %v2387_v57 = vld [vmem:[#allocation2 + $0x19c] ss:$12 sps:$4 sm:$0xff]  }
  0x26   :  { %1071 = vmatprep.subr.bf16.mxu0 %v2344_v10  ;;  %v2429_v53 = vld [vmem:[#allocation2 + $0x1a0] ss:$12 sps:$4 sm:$0xff]   ;;  %v2434_v58 = vld [vmem:[#allocation2 + $0x1b8] ss:$12 sps:$4 sm:$0xff]   ;;  %v2438_v59 = vld [vmem:[#allocation2 + $0x290] ss:$12 sps:$4 sm:$0xff]  }
  0x27   :  { %v2380_v56 = vld [vmem:[#allocation2 + $0x180] ss:$12 sps:$4 sm:$0xff]   ;;  %v2385_v60 = vld [vmem:[#allocation2 + $0x198] ss:$12 sps:$4 sm:$0xff]   ;;  %v2439_v62 = vld [vmem:[#allocation2 + $0x1d0] ss:$12 sps:$4 sm:$0xff]  }
  0x28   :  { %2212 = vmatpush3.bf16.msra.mxu1 %v2399_v28  ;;  %v2392_v61 = vld [vmem:[#allocation2 + $0x1b4] ss:$12 sps:$4 sm:$0xff]   ;;  %v2390_v0 = vld [vmem:[#allocation2 + $0x1b0] ss:$12 sps:$4 sm:$0xff]   ;;  %v2397_v1 = vld [vmem:[#allocation2 + $0x1cc] ss:$12 sps:$4 sm:$0xff]  }
  0x29   :  { %1072 = vmatpush1.bf16.msra.mxu0 %v2346_v11  ;;  %2213 = vmatprep.subr.bf16.mxu1 %v2403_v31  ;;  %v2443_v63 = vld [vmem:[#allocation2 + $0x2a8] ss:$12 sps:$4 sm:$0xff]   ;;  %v2448_v3 = vld [vmem:[#allocation2 + $0x2c0] ss:$12 sps:$4 sm:$0xff]   ;;  %v2402_v5 = vld [vmem:[#allocation2 + $0x1e4] ss:$12 sps:$4 sm:$0xff]  }
  0x2a   :  { %1073 = vmatprep.subr.bf16.mxu0 %v2347_v12  ;;  %v2444_v2 = vld [vmem:[#allocation2 + $0x1e8] ss:$12 sps:$4 sm:$0xff]   ;;  %v2449_v6 = vld [vmem:[#allocation2 + $0x200] ss:$12 sps:$4 sm:$0xff]   ;;  %v2453_v7 = vld [vmem:[#allocation2 + $0x2d8] ss:$12 sps:$4 sm:$0xff]  }
  0x2b   :  { %v2395_v4 = vld [vmem:[#allocation2 + $0x1c8] ss:$12 sps:$4 sm:$0xff]   ;;  %v2462_v8 = vld [vmem:[%s3027_s0 + $0xc] ss:$24 sps:$4 sm:$0xff]   ;;  %v2458_v12 = vld [vmem:[#allocation2 + $0x2f0] ss:$12 sps:$4 sm:$0xff]  }
  0x2c   :  { %2214 = vmatpush3.bf16.msra.mxu1 %v2404_v32  ;;  %v2400_v9 = vld [vmem:[#allocation2 + $0x1e0] ss:$12 sps:$4 sm:$0xff]   ;;  %v2407_v10 = vld [vmem:[#allocation2 + $0x1fc] ss:$12 sps:$4 sm:$0xff]   ;;  %v2454_v11 = vld [vmem:[#allocation2 + $0x218] ss:$12 sps:$4 sm:$0xff]  }
  0x2d   :  { %1074 = vmatpush1.bf16.msra.mxu0 %v2349_v14  ;;  %2215 = vmatprep.subr.bf16.mxu1 %v2408_v34  ;;  %v2405_v13 = vld [vmem:[#allocation2 + $0x1f8] ss:$12 sps:$4 sm:$0xff]   ;;  %v2412_v14 = vld [vmem:[#allocation2 + $0x214] ss:$12 sps:$4 sm:$0xff]   ;;  %v2410_v17 = vld [vmem:[#allocation2 + $0x210] ss:$12 sps:$4 sm:$0xff]  }
  0x2e   :  { %1075 = vmatprep.subr.bf16.mxu0 %v2350_v15  ;;  %v2459_v15 = vld [vmem:[#allocation2 + $0x230] ss:$12 sps:$4 sm:$0xff]   ;;  %v2466_v16 = vld [vmem:[#allocation2 + $0x3c8] ss:$12 sps:$4 sm:$0xff]   ;;  %v2417_v20 = vld [vmem:[#allocation2 + $0x22c] ss:$12 sps:$4 sm:$0xff]  }
  0x2f   :  { %v2471_v21 = vld [vmem:[#allocation2 + $0x3e0] ss:$12 sps:$4 sm:$0xff]   ;;  %v2476_v25 = vld [vmem:[#allocation2 + $0x3f8] ss:$12 sps:$4 sm:$0xff]   ;;  %v2427_v27 = vld [vmem:[#allocation2 + $0x25c] ss:$12 sps:$4 sm:$0xff]  }
  0x30   :  { %2216 = vmatpush3.bf16.msra.mxu1 %v2409_v37  ;;  %v2472_v24 = vld [vmem:[#allocation2 + $0x320] ss:$12 sps:$4 sm:$0xff]   ;;  %v2477_v28 = vld [vmem:[#allocation2 + $0x338] ss:$12 sps:$4 sm:$0xff]   ;;  %v2482_v32 = vld [vmem:[#allocation2 + $0x350] ss:$12 sps:$4 sm:$0xff]  }
  0x31   :  { %1076 = vmatpush1.bf16.msra.mxu0 %v2352_v18  ;;  %2217 = vmatprep.subr.bf16.mxu1 %v2413_v38  ;;  %v2753_v18 = vld [vmem:[%s3027_s0 + $0x8] ss:$24 sps:$4 sm:$0xff]   ;;  %v2430_v34 = vld [vmem:[#allocation2 + $0x270] ss:$12 sps:$4 sm:$0xff]   ;;  %v2505_v38 = vld [vmem:[%s3027_s0 + $0x14] ss:$24 sps:$4 sm:$0xff]  }
  0x32   :  { %1077 = vmatprep.subr.bf16.mxu0 %v2353_v19  ;;  %v2467_v19 = vld [vmem:[#allocation2 + $0x308] ss:$12 sps:$4 sm:$0xff]   ;;  %v2491_v37 = vld [vmem:[#allocation2 + $0x440] ss:$12 sps:$4 sm:$0xff]   ;;  %vm1807_vm0 = vcmask 523264   ;;  %vm2675_vm1 = vmmov 0  }
  0x33   :  { %v2432_v31 = vld [vmem:[#allocation2 + $0x274] ss:$12 sps:$4 sm:$0xff]  }
  0x34   :  { %2218 = vmatpush3.bf16.msra.mxu1 %v2414_v41  ;;  %v2492_v41 = vld [vmem:[#allocation2 + $0x380] ss:$12 sps:$4 sm:$0xff]  }
  0x35   :  { %1078 = vmatpush1.bf16.msra.mxu0 %v2355_v22  ;;  %2219 = vmatprep.subr.bf16.mxu1 %v2418_v42  ;;  %v2415_v22 = vld [vmem:[#allocation2 + $0x228] ss:$12 sps:$4 sm:$0xff]   ;;  %v2496_v42 = vld [vmem:[#allocation2 + $0x458] ss:$12 sps:$4 sm:$0xff]  }
  0x36   :  { %1079 = vmatprep.subr.bf16.mxu0 %v2356_v23  ;;  %v2422_v23 = vld [vmem:[#allocation2 + $0x244] ss:$12 sps:$4 sm:$0xff]  }
  0x38   :  { %2220 = vmatpush3.bf16.msra.mxu1 %v2419_v45  ;;  %v2497_v45 = vld [vmem:[#allocation2 + $0x398] ss:$12 sps:$4 sm:$0xff]  }
  0x39   :  { %1080 = vmatpush1.bf16.msra.mxu0 %v2358_v26  ;;  %2227 = vmatprep.subr.bf16.mxu1 %v2423_v46  ;;  %v2420_v26 = vld [vmem:[#allocation2 + $0x240] ss:$12 sps:$4 sm:$0xff]   ;;  %v2501_v46 = vld [vmem:[#allocation2 + $0x470] ss:$12 sps:$4 sm:$0xff]  }
  0x3a   :  { %1081 = vmatprep.subr.bf16.mxu0 %v2359_v29  ;;  %v2481_v29 = vld [vmem:[#allocation2 + $0x410] ss:$12 sps:$4 sm:$0xff]  }
  0x3b   :  { %1223 = vmatmul.mubr.bf16.vlgmr.msra.gmra.mrb[0].mxu1 %v2377_v49 }
  0x3c   :  { %2228 = vmatpush3.bf16.msra.mxu1 %v2424_v50  ;;  %1263 = vmatprep.mubr.bf16.mxu1 %v2462_v8  ;;  %v2532_v50 = vld [vmem:[%s3030_s3 + $0x4] ss:$8 sps:$4 sm:$0xff]  }
  0x3d   :  { %1082 = vmatpush1.bf16.msra.mxu0 %v2361_v30  ;;  %2229 = vmatprep.subr.bf16.mxu1 %v2428_v51  ;;  %v2425_v30 = vld [vmem:[#allocation2 + $0x258] ss:$12 sps:$4 sm:$0xff]   ;;  %v2450_v51 = vld [vmem:[#allocation2 + $0x2d0] ss:$12 sps:$4 sm:$0xff]  }
  0x3e   :  { %1083 = vmatprep.subr.bf16.mxu0 %v2362_v33  ;;  %v2486_v33 = vld [vmem:[#allocation2 + $0x428] ss:$12 sps:$4 sm:$0xff]  }
  0x40   :  { %2230 = vmatpush3.bf16.msra.mxu1 %v2429_v53  ;;  %v2457_v53 = vld [vmem:[#allocation2 + $0x2ec] ss:$12 sps:$4 sm:$0xff]  }
  0x41   :  { %1084 = vmatpush1.bf16.msra.mxu0 %v2364_v35  ;;  %2231 = vmatprep.subr.bf16.mxu1 %v2433_v55  ;;  %v2437_v35 = vld [vmem:[#allocation2 + $0x28c] ss:$12 sps:$4 sm:$0xff]   ;;  %v2535_v55 = vld [vmem:[%s3030_s3 + $0x14] ss:$8 sps:$4 sm:$0xff]  }
  0x42   :  { %1085 = vmatprep.subr.bf16.mxu0 %v2365_v36  ;;  %v2487_v36 = vld [vmem:[#allocation2 + $0x368] ss:$12 sps:$4 sm:$0xff]  }
  0x44   :  { %2232 = vmatpush3.bf16.msra.mxu1 %v2434_v58  ;;  %v2465_v58 = vld [vmem:[#allocation2 + $0x304] ss:$12 sps:$4 sm:$0xff]  }
  0x45   :  { %1086 = vmatpush1.bf16.msra.mxu0 %v2367_v39  ;;  %2233 = vmatprep.subr.bf16.mxu1 %v2438_v59  ;;  %v2435_v39 = vld [vmem:[#allocation2 + $0x288] ss:$12 sps:$4 sm:$0xff]   ;;  %v2538_v59 = vld [vmem:[%s3030_s3 + $0x24] ss:$8 sps:$4 sm:$0xff]  }
  0x46   :  { %1087 = vmatprep.subr.bf16.mxu0 %v2368_v40  ;;  %v2442_v40 = vld [vmem:[#allocation2 + $0x2a4] ss:$12 sps:$4 sm:$0xff]  }
  0x48   :  { %2234 = vmatpush3.bf16.msra.mxu1 %v2439_v62  ;;  %v2536_v62 = vld [vmem:[%s3030_s3 + $0x20] ss:$8 sps:$4 sm:$0xff]  }
  0x49   :  { %1088 = vmatpush1.bf16.msra.mxu0 %v2370_v43  ;;  %2235 = vmatprep.subr.bf16.mxu1 %v2443_v63  ;;  %v2440_v43 = vld [vmem:[#allocation2 + $0x2a0] ss:$12 sps:$4 sm:$0xff]   ;;  %v2541_v63 = vld [vmem:[%s3030_s3 + $0x34] ss:$8 sps:$4 sm:$0xff]  }
  0x4a   :  { %1089 = vmatprep.subr.bf16.mxu0 %v2371_v44  ;;  %v2447_v44 = vld [vmem:[#allocation2 + $0x2bc] ss:$12 sps:$4 sm:$0xff]  }
  0x4c   :  { %2236 = vmatpush3.bf16.msra.mxu1 %v2444_v2  ;;  %v2539_v2 = vld [vmem:[%s3030_s3 + $0x30] ss:$8 sps:$4 sm:$0xff]  }
  0x4d   :  { %1090 = vmatpush1.bf16.msra.mxu0 %v2373_v47  ;;  %2237 = vmatprep.subr.bf16.mxu1 %v2448_v3  ;;  %v2445_v47 = vld [vmem:[#allocation2 + $0x2b8] ss:$12 sps:$4 sm:$0xff]   ;;  %v2473_v3 = vld [vmem:[#allocation2 + $0x330] ss:$12 sps:$4 sm:$0xff]  }
  0x4e   :  { %1091 = vmatprep.subr.bf16.mxu0 %v2374_v48  ;;  %v2502_v48 = vld [vmem:[#allocation2 + $0x3b0] ss:$12 sps:$4 sm:$0xff]  }
  0x50   :  { %2238 = vmatpush3.bf16.msra.mxu1 %v2449_v6  ;;  %v2485_v6 = vld [vmem:[#allocation2 + $0x364] ss:$12 sps:$4 sm:$0xff]  }
  0x51   :  { %1092 = vmatpush1.bf16.msra.mxu0 %v2376_v52  ;;  %2239 = vmatprep.subr.bf16.mxu1 %v2453_v7  ;;  %v2765_v52 = vld [vmem:[%s3027_s0 + $0x10] ss:$24 sps:$4 sm:$0xff]   ;;  %v2483_v7 = vld [vmem:[#allocation2 + $0x360] ss:$12 sps:$4 sm:$0xff]  }
  0x52   :  { %1104 = vmatprep.subr.bf16.mxu0 %v2382_v54  ;;  %v2530_v54 = vld [vmem:[%s3030_s3] ss:$8 sps:$4 sm:$0xff]  }
  0x54   :  { %1094 = vmatmul.mubr.bf16.vlgmr.msra.gmra.mrb[0].mxu0 %v2377_v49  ;;  %2240 = vmatpush3.bf16.msra.mxu1 %v2454_v11  ;;  %v2452_v49 = vld [vmem:[#allocation2 + $0x2d4] ss:$12 sps:$4 sm:$0xff]   ;;  %v2488_v11 = vld [vmem:[#allocation2 + $0x378] ss:$12 sps:$4 sm:$0xff]  }
  0x55   :  { %1105 = vmatpush1.bf16.msra.mxu0 %v2380_v56  ;;  %1136 = vmatprep.mubr.bf16.mxu0 %v2462_v8  ;;  %v2455_v56 = vld [vmem:[#allocation2 + $0x2e8] ss:$12 sps:$4 sm:$0xff]  }
  0x56   :  { %1106 = vmatprep.subr.bf16.mxu0 %v2387_v57  ;;  %2241 = vmatprep.subr.bf16.mxu1 %v2458_v12  ;;  %v2533_v57 = vld [vmem:[%s3030_s3 + $0x10] ss:$8 sps:$4 sm:$0xff]   ;;  %v2542_v8 = vld [vmem:[%s3030_s3 + $0x40] ss:$8 sps:$4 sm:$0xff]  }
  0x57   :  { %v2495_v12 = vld [vmem:[#allocation2 + $0x394] ss:$12 sps:$4 sm:$0xff]  }
  0x58   :  { %2242 = vmatpush3.bf16.msra.mxu1 %v2459_v15  ;;  %v2498_v15 = vld [vmem:[#allocation2 + $0x3a8] ss:$12 sps:$4 sm:$0xff]  }
  0x59   :  { %1107 = vmatpush1.bf16.msra.mxu0 %v2385_v60  ;;  %2249 = vmatprep.subr.bf16.mxu1 %v2466_v16  ;;  %v2463_v60 = vld [vmem:[#allocation2 + $0x300] ss:$12 sps:$4 sm:$0xff]   ;;  %v2508_v16 = vld [vmem:[#allocation2 + $0x3c4] ss:$12 sps:$4 sm:$0xff]  }
  0x5a   :  { %1108 = vmatprep.subr.bf16.mxu0 %v2392_v61  ;;  %v2470_v61 = vld [vmem:[#allocation2 + $0x31c] ss:$12 sps:$4 sm:$0xff]  }
  0x5b   :  { %1264 = vmatmul.mubr.bf16.vlgmr.msra.gmra.mrb[4].mxu1 %v2753_v18 }
  0x5c   :  { %2250 = vmatpush3.bf16.msra.mxu1 %v2467_v19  ;;  %1304 = vmatprep.mubr.bf16.mxu1 %v2505_v38  ;;  %v2509_v19 = vld [vmem:[#allocation2 + $0x3d8] ss:$12 sps:$4 sm:$0xff]  }
  0x5d   :  { %1109 = vmatpush1.bf16.msra.mxu0 %v2390_v0  ;;  %2251 = vmatprep.subr.bf16.mxu1 %v2471_v21  ;;  %v2468_v0 = vld [vmem:[#allocation2 + $0x318] ss:$12 sps:$4 sm:$0xff]   ;;  %v2512_v21 = vld [vmem:[#allocation2 + $0x3f0] ss:$12 sps:$4 sm:$0xff]  }
  0x5e   :  { %1110 = vmatprep.subr.bf16.mxu0 %v2397_v1  ;;  %v2475_v1 = vld [vmem:[#allocation2 + $0x334] ss:$12 sps:$4 sm:$0xff]  }
  0x60   :  { %2252 = vmatpush3.bf16.msra.mxu1 %v2472_v24  ;;  %v2520_v24 = vld [vmem:[#allocation2 + $0x424] ss:$12 sps:$4 sm:$0xff]  }
  0x61   :  { %1111 = vmatpush1.bf16.msra.mxu0 %v2395_v4  ;;  %2253 = vmatprep.subr.bf16.mxu1 %v2476_v25  ;;  %v2480_v4 = vld [vmem:[#allocation2 + $0x34c] ss:$12 sps:$4 sm:$0xff]  }
  0x62   :  { %1112 = vmatprep.subr.bf16.mxu0 %v2402_v5  ;;  %v2478_v5 = vld [vmem:[#allocation2 + $0x348] ss:$12 sps:$4 sm:$0xff]   ;;  %v2545_v25 = vld [vmem:[%s3030_s3 + $0x50] ss:$8 sps:$4 sm:$0xff]  }
  0x64   :  { %2254 = vmatpush3.bf16.msra.mxu1 %v2477_v28  ;;  %v2523_v28 = vld [vmem:[#allocation2 + $0x43c] ss:$12 sps:$4 sm:$0xff]  }
  0x65   :  { %1113 = vmatpush1.bf16.msra.mxu0 %v2400_v9  ;;  %2255 = vmatprep.subr.bf16.mxu1 %v2481_v29  ;;  %v2544_v9 = vld [vmem:[%s3030_s3 + $0x44] ss:$8 sps:$4 sm:$0xff]  }
  0x66   :  { %1114 = vmatprep.subr.bf16.mxu0 %v2407_v10  ;;  %v2490_v10 = vld [vmem:[#allocation2 + $0x37c] ss:$12 sps:$4 sm:$0xff]   ;;  %v2521_v29 = vld [vmem:[#allocation2 + $0x438] ss:$12 sps:$4 sm:$0xff]  }
  0x68   :  { %2256 = vmatpush3.bf16.msra.mxu1 %v2482_v32  ;;  %v2529_v32 = vld [vmem:[#allocation2 + $0x46c] ss:$12 sps:$4 sm:$0xff]  }
  0x69   :  { %1115 = vmatpush1.bf16.msra.mxu0 %v2405_v13  ;;  %2257 = vmatprep.subr.bf16.mxu1 %v2486_v33  ;;  %v2493_v13 = vld [vmem:[#allocation2 + $0x390] ss:$12 sps:$4 sm:$0xff]   ;;  %v2527_v33 = vld [vmem:[#allocation2 + $0x468] ss:$12 sps:$4 sm:$0xff]  }
  0x6a   :  { %1116 = vmatprep.subr.bf16.mxu0 %v2412_v14  ;;  %v2500_v14 = vld [vmem:[#allocation2 + $0x3ac] ss:$12 sps:$4 sm:$0xff]  }
  0x6c   :  { %2258 = vmatpush3.bf16.msra.mxu1 %v2487_v36  ;;  %v2551_v36 = vld [vmem:[%s3030_s3 + $0x70] ss:$8 sps:$4 sm:$0xff]  }
  0x6d   :  { %1117 = vmatpush1.bf16.msra.mxu0 %v2410_v17  ;;  %2259 = vmatprep.subr.bf16.mxu1 %v2491_v37  ;;  %v2506_v17 = vld [vmem:[#allocation2 + $0x3c0] ss:$12 sps:$4 sm:$0xff]   ;;  %v2553_v37 = vld [vmem:[%s3030_s3 + $0x74] ss:$8 sps:$4 sm:$0xff]  }
  0x6e   :  { %1118 = vmatprep.subr.bf16.mxu0 %v2417_v20  ;;  %v2514_v20 = vld [vmem:[#allocation2 + $0x3f4] ss:$12 sps:$4 sm:$0xff]  }
  0x70   :  { %2260 = vmatpush3.bf16.msra.mxu1 %v2492_v41  ;;  %v2557_v41 = vld [vmem:[%s3030_s3 + $0x90] ss:$8 sps:$4 sm:$0xff]  }
  0x71   :  { %1119 = vmatpush1.bf16.msra.mxu0 %v2415_v22  ;;  %2261 = vmatprep.subr.bf16.mxu1 %v2496_v42  ;;  %v2517_v22 = vld [vmem:[#allocation2 + $0x40c] ss:$12 sps:$4 sm:$0xff]  }
  0x72   :  { %1120 = vmatprep.subr.bf16.mxu0 %v2422_v23  ;;  %v2515_v23 = vld [vmem:[#allocation2 + $0x408] ss:$12 sps:$4 sm:$0xff]   ;;  %v2562_v42 = vld [vmem:[%s3030_s3 + $0xa4] ss:$8 sps:$4 sm:$0xff]  }
  0x74   :  { %2262 = vmatpush3.bf16.msra.mxu1 %v2497_v45  ;;  %v2563_v45 = vld [vmem:[%s3030_s3 + $0xb0] ss:$8 sps:$4 sm:$0xff]  }
  0x75   :  { %1121 = vmatpush1.bf16.msra.mxu0 %v2420_v26  ;;  %2263 = vmatprep.subr.bf16.mxu1 %v2501_v46  ;;  %v2547_v26 = vld [vmem:[%s3030_s3 + $0x54] ss:$8 sps:$4 sm:$0xff]   ;;  %v2568_v46 = vld [vmem:[%s3030_s3 + $0xc4] ss:$8 sps:$4 sm:$0xff]  }
  0x76   :  { %1122 = vmatprep.subr.bf16.mxu0 %v2427_v27  ;;  %v2518_v27 = vld [vmem:[#allocation2 + $0x420] ss:$12 sps:$4 sm:$0xff]  }
  0x78   :  { %2264 = vmatpush3.bf16.msra.mxu1 %v2502_v48  ;;  %v2571_v48 = vld [vmem:[%s3030_s3 + $0xd4] ss:$8 sps:$4 sm:$0xff]  }
  0x79   :  { %1123 = vmatpush1.bf16.msra.mxu0 %v2425_v30  ;;  %1616 = vmatprep.subr.bf16.mxu1 %v2532_v50  ;;  %v2526_v30 = vld [vmem:[#allocation2 + $0x454] ss:$12 sps:$4 sm:$0xff]  }
  0x7a   :  { %1124 = vmatprep.subr.bf16.mxu0 %v2432_v31  ;;  %v2524_v31 = vld [vmem:[#allocation2 + $0x450] ss:$12 sps:$4 sm:$0xff]  }
  0x7b   :  { %1305 = vmatmul.mubr.bf16.vlgmr.msra.gmra.mrb[8].mxu1 %v2765_v52 }
  0x7c   :  { %1617 = vmatpush1.bf16.msra.mxu1 %v2530_v54 }
  0x7d   :  { %1125 = vmatpush1.bf16.msra.mxu0 %v2430_v34  ;;  %1618 = vmatprep.subr.bf16.mxu1 %v2535_v55  ;;  %v2548_v34 = vld [vmem:[%s3030_s3 + $0x60] ss:$8 sps:$4 sm:$0xff]  }
  0x7e   :  { %1126 = vmatprep.subr.bf16.mxu0 %v2437_v35  ;;  %v2550_v35 = vld [vmem:[%s3030_s3 + $0x64] ss:$8 sps:$4 sm:$0xff]  }
  0x80   :  { %1619 = vmatpush1.bf16.msra.mxu1 %v2533_v57  ;;  %v2572_v57 = vld [vmem:[%s3030_s3 + $0xe0] ss:$8 sps:$4 sm:$0xff]  }
  0x81   :  { %1127 = vmatpush1.bf16.msra.mxu0 %v2435_v39  ;;  %1620 = vmatprep.subr.bf16.mxu1 %v2538_v59  ;;  %v2554_v39 = vld [vmem:[%s3030_s3 + $0x80] ss:$8 sps:$4 sm:$0xff]   ;;  %v2575_v59 = vld [vmem:[%s3030_s3 + $0xf0] ss:$8 sps:$4 sm:$0xff]  }
  0x82   :  { %1128 = vmatprep.subr.bf16.mxu0 %v2442_v40  ;;  %v2559_v40 = vld [vmem:[%s3030_s3 + $0x94] ss:$8 sps:$4 sm:$0xff]  }
  0x84   :  { %1621 = vmatpush1.bf16.msra.mxu1 %v2536_v62 }
  0x85   :  { %1129 = vmatpush1.bf16.msra.mxu0 %v2440_v43  ;;  %1622 = vmatprep.subr.bf16.mxu1 %v2541_v63  ;;  %v2560_v43 = vld [vmem:[%s3030_s3 + $0xa0] ss:$8 sps:$4 sm:$0xff]  }
  0x86   :  { %1130 = vmatprep.subr.bf16.mxu0 %v2447_v44  ;;  %v2565_v44 = vld [vmem:[%s3030_s3 + $0xb4] ss:$8 sps:$4 sm:$0xff]  }
  0x88   :  { %1623 = vmatpush1.bf16.msra.mxu1 %v2539_v2 }
  0x89   :  { %1131 = vmatpush1.bf16.msra.mxu0 %v2445_v47  ;;  %1624 = vmatprep.subr.bf16.mxu1 %v2544_v9  ;;  %v2566_v47 = vld [vmem:[%s3030_s3 + $0xc0] ss:$8 sps:$4 sm:$0xff]  }
  0x8a   :  { %1132 = vmatprep.subr.bf16.mxu0 %v2452_v49  ;;  %v2569_v49 = vld [vmem:[%s3030_s3 + $0xd0] ss:$8 sps:$4 sm:$0xff]  }
  0x8c   :  { %1625 = vmatpush1.bf16.msra.mxu1 %v2542_v8 }
  0x8d   :  { %1133 = vmatpush1.bf16.msra.mxu0 %v2450_v51  ;;  %1626 = vmatprep.subr.bf16.mxu1 %v2547_v26 }
  0x8e   :  { %1134 = vmatprep.subr.bf16.mxu0 %v2457_v53 }
  0x90   :  { %1627 = vmatpush1.bf16.msra.mxu1 %v2545_v25 }
  0x91   :  { %1135 = vmatpush1.bf16.msra.mxu0 %v2455_v56  ;;  %1628 = vmatprep.subr.bf16.mxu1 %v2550_v35  ;;  %v2574_v56 = vld [vmem:[%s3030_s3 + $0xe4] ss:$8 sps:$4 sm:$0xff]  }
  0x92   :  { %1147 = vmatprep.subr.bf16.mxu0 %v2465_v58  ;;  %v2577_v58 = vld [vmem:[%s3030_s3 + $0xf4] ss:$8 sps:$4 sm:$0xff]  }
  0x94   :  { %1137 = vmatmul.mubr.bf16.vlgmr.msra.gmra.mrb[0].mxu0 %v2753_v18  ;;  %v2511_v18 = vld [vmem:[#allocation2 + $0x3dc] ss:$12 sps:$4 sm:$0xff]   ;;  %1629 = vmatpush1.bf16.msra.mxu1 %v2548_v34 }
  0x95   :  { %1148 = vmatpush1.bf16.msra.mxu0 %v2463_v60  ;;  %1179 = vmatprep.mubr.bf16.mxu0 %v2505_v38  ;;  %v2556_v38 = vld [vmem:[%s3030_s3 + $0x84] ss:$8 sps:$4 sm:$0xff]  }
  0x96   :  { %1149 = vmatprep.subr.bf16.mxu0 %v2470_v61  ;;  %1630 = vmatprep.subr.bf16.mxu1 %v2553_v37  ;;  %v2580_v60 = vld [vmem:[%s3030_s3 + $0x104] ss:$8 sps:$4 sm:$0xff]   ;;  %v248_v61 = vlaneseq }
  0x98   :  { %1631 = vmatpush1.bf16.msra.mxu1 %v2551_v36  ;;  %v2866_v62 = vshrl.u32 %v248_v61, 7  ;;  %v2612_v61 = vld [vmem:[%s3032_s5 + $0x50] sm:$0xff]  }
  0x99   :  { %1150 = vmatpush1.bf16.msra.mxu0 %v2468_v0  ;;  %1632 = vmatprep.subr.bf16.mxu1 %v2556_v38  ;;  %v246_v0 = vld [vmem:[%s3029_s2] sm:$0x7] }
  0x9a   :  { %1151 = vmatprep.subr.bf16.mxu0 %v2475_v1  ;;  %v258_v63 = vsub.s32 2, %v2866_v62 }
  0x9c   :  { %1633 = vmatpush1.bf16.msra.mxu1 %v2554_v39  ;;  %v259_v1 = vrot.slane %v246_v0, %v258_v63  ;;  %v2613_v63 = vld [vmem:[%s3032_s5 + $0x58] sm:$0xff]  }
  0x9d   :  { %1152 = vmatpush1.bf16.msra.mxu0 %v2473_v3  ;;  %1634 = vmatprep.subr.bf16.mxu1 %v2559_v40 }
  0x9e   :  { %1153 = vmatprep.subr.bf16.mxu0 %v2480_v4 }
  0xa0   :  { %1635 = vmatpush1.bf16.msra.mxu1 %v2557_v41 }
  0xa1   :  { %1154 = vmatpush1.bf16.msra.mxu0 %v2478_v5  ;;  %1636 = vmatprep.subr.bf16.mxu1 %v2562_v42 }
  0xa2   :  { %1155 = vmatprep.subr.bf16.mxu0 %v2485_v6 }
  0xa4   :  { %1637 = vmatpush1.bf16.msra.mxu1 %v2560_v43 }
  0xa5   :  { %1156 = vmatpush1.bf16.msra.mxu0 %v2483_v7  ;;  %1638 = vmatprep.subr.bf16.mxu1 %v2565_v44 }
  0xa6   :  { %1157 = vmatprep.subr.bf16.mxu0 %v2490_v10 }
  0xa8   :  { %1639 = vmatpush1.bf16.msra.mxu1 %v2563_v45 }
  0xa9   :  { %1158 = vmatpush1.bf16.msra.mxu0 %v2488_v11  ;;  %1640 = vmatprep.subr.bf16.mxu1 %v2568_v46  ;;  %v2578_v46 = vld [vmem:[%s3030_s3 + $0x100] ss:$8 sps:$4 sm:$0xff]  }
  0xaa   :  { %1159 = vmatprep.subr.bf16.mxu0 %v2495_v12  ;;  %v2673_v12 = vmov 0  }
  0xac   :  { %1641 = vmatpush1.bf16.msra.mxu1 %v2566_v47  ;;  %v2583_v47 = vld [vmem:[%s3030_s3 + $0x114] ss:$8 sps:$4 sm:$0xff]  }
  0xad   :  { %1160 = vmatpush1.bf16.msra.mxu0 %v2493_v13  ;;  %1642 = vmatprep.subr.bf16.mxu1 %v2571_v48  ;;  %v2602_v13 = vld [vmem:[%s3032_s5] sm:$0xff]   ;;  %v2581_v48 = vld [vmem:[%s3030_s3 + $0x110] ss:$8 sps:$4 sm:$0xff]  }
  0xae   :  { %1161 = vmatprep.subr.bf16.mxu0 %v2500_v14  ;;  %v2603_v14 = vld [vmem:[%s3032_s5 + $0x8] sm:$0xff]  }
  0xb0   :  { %1643 = vmatpush1.bf16.msra.mxu1 %v2569_v49  ;;  %v2586_v49 = vld [vmem:[%s3030_s3 + $0x124] ss:$8 sps:$4 sm:$0xff]  }
  0xb1   :  { %1162 = vmatpush1.bf16.msra.mxu0 %v2498_v15  ;;  %1644 = vmatprep.subr.bf16.mxu1 %v2574_v56  ;;  %v2604_v15 = vld [vmem:[%s3032_s5 + $0x10] sm:$0xff]  }
  0xb2   :  { %1163 = vmatprep.subr.bf16.mxu0 %v2508_v16  ;;  %v2605_v16 = vld [vmem:[%s3032_s5 + $0x18] sm:$0xff]  }
  0xb3   :  { %v2593_v56 = vld [vmem:[%s3030_s3 + $0x150] ss:$8 sps:$4 sm:$0xff]  }
  0xb4   :  { %1645 = vmatpush1.bf16.msra.mxu1 %v2572_v57  ;;  %v2598_v57 = vld [vmem:[%s3030_s3 + $0x164] ss:$8 sps:$4 sm:$0xff]  }
  0xb5   :  { %1164 = vmatpush1.bf16.msra.mxu0 %v2506_v17  ;;  %1646 = vmatprep.subr.bf16.mxu1 %v2577_v58  ;;  %v2606_v17 = vld [vmem:[%s3032_s5 + $0x20] sm:$0xff]  }
  0xb6   :  { %1165 = vmatprep.subr.bf16.mxu0 %v2511_v18  ;;  %v2596_v58 = vld [vmem:[%s3030_s3 + $0x160] ss:$8 sps:$4 sm:$0xff]  }
  0xb8   :  { %1647 = vmatpush1.bf16.msra.mxu1 %v2575_v59  ;;  %v2601_v59 = vld [vmem:[%s3030_s3 + $0x174] ss:$8 sps:$4 sm:$0xff]  }
  0xb9   :  { %1166 = vmatpush1.bf16.msra.mxu0 %v2509_v19  ;;  %1659 = vmatprep.subr.bf16.mxu1 %v2580_v60  ;;  %v2599_v60 = vld [vmem:[%s3030_s3 + $0x170] ss:$8 sps:$4 sm:$0xff]  }
  0xba   :  { %1167 = vmatprep.subr.bf16.mxu0 %v2514_v20 }
  0xbd   :  { %1168 = vmatpush1.bf16.msra.mxu0 %v2512_v21 }
  0xbe   :  { %1169 = vmatprep.subr.bf16.mxu0 %v2517_v22 }
  0xc1   :  { %1170 = vmatpush1.bf16.msra.mxu0 %v2515_v23  ;;  %v2607_v23 = vld [vmem:[%s3032_s5 + $0x28] sm:$0xff]  }
  0xc2   :  { %1171 = vmatprep.subr.bf16.mxu0 %v2520_v24 }
  0xc5   :  { %1172 = vmatpush1.bf16.msra.mxu0 %v2518_v27  ;;  %v2608_v27 = vld [vmem:[%s3032_s5 + $0x30] sm:$0xff]  }
  0xc6   :  { %1173 = vmatprep.subr.bf16.mxu0 %v2523_v28 }
  0xc9   :  { %1174 = vmatpush1.bf16.msra.mxu0 %v2521_v29  ;;  %v2609_v29 = vld [vmem:[%s3032_s5 + $0x38] sm:$0xff]  }
  0xca   :  { %1175 = vmatprep.subr.bf16.mxu0 %v2526_v30  ;;  %v2610_v30 = vld [vmem:[%s3032_s5 + $0x40] sm:$0xff]  }
  0xcd   :  { %1176 = vmatpush1.bf16.msra.mxu0 %v2524_v31  ;;  %v2611_v31 = vld [vmem:[%s3032_s5 + $0x48] sm:$0xff]  }
  0xce   :  { %1177 = vmatprep.subr.bf16.mxu0 %v2529_v32  ;;  %v250_v32 = vsub.s32 0, %v2866_v62 }
  0xd0   :  { %v251_v34 = vrot.slane %v246_v0, %v250_v32 }
  0xd1   :  { %1178 = vmatpush1.bf16.msra.mxu0 %v2527_v33  ;;  %v254_v33 = vsub.s32 1, %v2866_v62  ;;  %v2621_v62 = vld [vmem:[%s3034_s7 + $0x38] sm:$0xff]  }
  0xd2   :  { %1811 = vmatprep.subr.bf16.mxu0 %v2673_v12 }
  0xd3   :  { %v255_v36 = vrot.slane %v246_v0, %v254_v33  ;;  %v2614_v0 = vld [vmem:[%s3034_s7] sm:$0xff]  }
  0xd4   :  { %1180 = vmatmul.mubr.bf16.vlgmr.msra.gmra.mrb[0].mxu0 %v2765_v52 }
  0xd5   :  { %1812 = vmatpush1.bf16.msra.mxu0 %v2602_v13 }
  0xd6   :  { %1813 = vmatprep.subr.bf16.mxu0 %v2673_v12 }
  0xd9   :  { %1814 = vmatpush1.bf16.msra.mxu0 %v2603_v14 }
  0xda   :  { %1815 = vmatprep.subr.bf16.mxu0 %v2673_v12 }
  0xdd   :  { %1816 = vmatpush1.bf16.msra.mxu0 %v2604_v15 }
  0xde   :  { %1817 = vmatprep.subr.bf16.mxu0 %v2673_v12 }
  0xe1   :  { %1818 = vmatpush1.bf16.msra.mxu0 %v2605_v16 }
  0xe2   :  { %1819 = vmatprep.subr.bf16.mxu0 %v2673_v12 }
  0xe5   :  { %1820 = vmatpush1.bf16.msra.mxu0 %v2606_v17 }
  0xe6   :  { %1821 = vmatprep.subr.bf16.mxu0 %v2673_v12 }
  0xe9   :  { %1822 = vmatpush1.bf16.msra.mxu0 %v2607_v23 }
  0xea   :  { %1823 = vmatprep.subr.bf16.mxu0 %v2673_v12 }
  0xed   :  { %1824 = vmatpush1.bf16.msra.mxu0 %v2608_v27 }
  0xee   :  { %1825 = vmatprep.subr.bf16.mxu0 %v2673_v12 }
  0xf1   :  { %1826 = vmatpush1.bf16.msra.mxu0 %v2609_v29  ;;  %v2196_v29 = vld [vmem:[%s3035_s8] ss:$0 sm:$0xff] }
  0xf2   :  { %1827 = vmatprep.subr.bf16.mxu0 %v2673_v12 }
  0xf5   :  { %1828 = vmatpush1.bf16.msra.mxu0 %v2610_v30 }
  0xf6   :  { %1829 = vmatprep.subr.bf16.mxu0 %v2673_v12 }
  0xf9   :  { %1830 = vmatpush1.bf16.msra.mxu0 %v2611_v31 }
  0xfa   :  { %1831 = vmatprep.subr.bf16.mxu0 %v2673_v12 }
  0xfd   :  { %1832 = vmatpush1.bf16.msra.mxu0 %v2612_v61 }
  0xfe   :  { %1833 = vmatprep.subr.bf16.mxu0 %v2673_v12 }
 0x101   :  { %1834 = vmatpush1.bf16.msra.mxu0 %v2613_v63 }
 0x10e   :  { %v2221_v50 = vpop.f32.mrb[0].mxu1 }
 0x10f   :  { %v2222_v51 = vpop.f32.mrb[1].mxu1 }
 0x110   :  { %v2223_v52 = vadd.f32 %v2222_v51, %v2221_v50  ;;  %v2224_v53 = vpop.f32.mrb[2].mxu1  ;;  %v2584_v50 = vld [vmem:[%s3030_s3 + $0x120] ss:$8 sps:$4 sm:$0xff]   ;;  %v2589_v51 = vld [vmem:[%s3030_s3 + $0x134] ss:$8 sps:$4 sm:$0xff]  }
 0x111   :  { %v2225_v54 = vpop.f32.mrb[3].mxu1 }
 0x112   :  { %v2226_v55 = vadd.f32 %v2225_v54, %v2224_v53  ;;  %v1225_v2 = vadd.f32 %v2223_v52, %v259_v1  ;;  %v2587_v52 = vld [vmem:[%s3030_s3 + $0x130] ss:$8 sps:$4 sm:$0xff]   ;;  %v2592_v53 = vld [vmem:[%s3030_s3 + $0x144] ss:$8 sps:$4 sm:$0xff]   ;;  %v2590_v54 = vld [vmem:[%s3030_s3 + $0x140] ss:$8 sps:$4 sm:$0xff]  }
 0x114   :  { %v1228_v5 = vadd.f32 %v2226_v55, %v259_v1  ;;  %v2595_v55 = vld [vmem:[%s3030_s3 + $0x154] ss:$8 sps:$4 sm:$0xff]   ;;  %v2674_v1 = vmov 0.0  }
 0x12e   :  { %v2243_v3 = vpop.f32.mrb[4].mxu1 }
 0x12f   :  { %v2244_v4 = vpop.f32.mrb[5].mxu1 }
 0x130   :  { %v2245_v6 = vadd.f32 %v2244_v4, %v2243_v3  ;;  %v2246_v7 = vpop.f32.mrb[6].mxu1  ;;  %v2616_v3 = vld [vmem:[%s3034_s7 + $0x10] sm:$0xff]   ;;  %v2617_v4 = vld [vmem:[%s3034_s7 + $0x18] sm:$0xff]  }
 0x131   :  { %v2247_v8 = vpop.f32.mrb[7].mxu1 }
 0x132   :  { %v1266_v9 = vadd.f32 %v2245_v6, %v1225_v2  ;;  %v2248_v10 = vadd.f32 %v2247_v8, %v2246_v7  ;;  %v2615_v2 = vld [vmem:[%s3034_s7 + $0x8] sm:$0xff]   ;;  %v1364_v7 = vld [vmem:[%s3031_s4] sm:$0x3] }
 0x133   :  { %v2619_v6 = vld [vmem:[%s3034_s7 + $0x28] sm:$0xff]   ;;  %v1369_v8 = vrot.slane %v1364_v7, %v250_v32 }
 0x134   :  { %v1269_v11 = vadd.f32 %v2248_v10, %v1228_v5  ;;  %v2618_v5 = vld [vmem:[%s3034_s7 + $0x20] sm:$0xff]   ;;  %v1373_v10 = vrot.slane %v1364_v7, %v254_v33 }
 0x14e   :  { %v2265_v18 = vpop.f32.mrb[8].mxu1 }
 0x14f   :  { %v2266_v19 = vpop.f32.mrb[9].mxu1 }
 0x150   :  { %v2267_v20 = vadd.f32 %v2266_v19, %v2265_v18  ;;  %v2268_v21 = vpop.f32.mrb[10].mxu1 }
 0x151   :  { %v2269_v22 = vpop.f32.mrb[11].mxu1 }
 0x152   :  { %v2895_v24 = vadd.f32 %v2267_v20, %v1266_v9  ;;  %v2270_v25 = vadd.f32 %v2269_v22, %v2268_v21  ;;  %v2620_v20 = vld [vmem:[%s3034_s7 + $0x30] sm:$0xff]   ;;  %v2182_v21 = vld [vmem:[%s3033_s6] ss:$0 sm:$0xff]  ;;  %s2676_s7 = smov [#allocation5]  }
 0x153   :  { %s1972_s13 = sshll.u32 %s2676_s7, 4  ;;  %s1973_s13 = int_to_ptr.vmem [resolvable:$true] %s1972_s13 }
 0x154   :  { %v2898_v26 = vadd.f32 %v2270_v25, %v1269_v11  ;;  %s2644_s6 = scalar_lea.vmem %s1973_s13, 256  ;;  %p2649_p9 = scmp.lt.s32.totalorder %s1973_s13, %s1973_s13 }
 0x155   :  { %p2645_p8 = scmp.ne.s32.totalorder %s1973_s13, %s2644_s6  ;;  %p2650_p10 = scmp.lt.s32.totalorder %s2644_s6, %s2644_s6 }
 0x156   :  { %v1315_v28 = vpack.c.bf16 %v2898_v26, %v2895_v24 }
 0x157   :  { %p2651_p11 = por %p2650_p10, %p2649_p9 }
 0x159   :  { %p2652_p12 = pnand %p2651_p11, %p2645_p8 }
 0x1a7   :  { %v1181_v35 = vpop.f32.mrb[0].mxu0 }
 0x1a8   :  { %v1183_v37 = vpop.f32.mrb[1].mxu0  ;;  %v2300_v39 = vadd.f32 %v1181_v35, %v251_v34 }
 0x1a9   :  { %v1185_v38 = vpop.f32.mrb[2].mxu0  ;;  %v2301_v42 = vadd.f32 %v1183_v37, %v255_v36 }
 0x1aa   :  { %v2302_v40 = vadd.f32 %v1185_v38, %v251_v34  ;;  %v1187_v41 = vpop.f32.mrb[3].mxu0 }
 0x1ab   :  { %v2303_v43 = vadd.f32 %v1187_v41, %v255_v36 }
 0x1ac   :  { %v1313_v44 = vpack.c.bf16 %v2302_v40, %v2300_v39 }
 0x1ad   :  { %v1314_v45 = vpack.c.bf16 %v2303_v43, %v2301_v42 }
 0x1af   :  { %1648 = vmatprep.mubr.bf16.mxu1 %v1314_v45 }
 0x1b0   :  { %1649 = vmatmul.mubr.bf16.vlgmr.msra.gmra.mrb[12].mxu1 %v1313_v44 }
 0x1b1   :  { %1660 = vmatpush1.bf16.msra.mxu1 %v2578_v46  ;;  %1691 = vmatprep.mubr.bf16.mxu1 %v2673_v12 }
 0x1b2   :  { %1661 = vmatprep.subr.bf16.mxu1 %v2583_v47 }
 0x1b5   :  { %1662 = vmatpush1.bf16.msra.mxu1 %v2581_v48 }
 0x1b6   :  { %1663 = vmatprep.subr.bf16.mxu1 %v2586_v49 }
 0x1b9   :  { %1664 = vmatpush1.bf16.msra.mxu1 %v2584_v50 }
 0x1ba   :  { %1665 = vmatprep.subr.bf16.mxu1 %v2589_v51 }
 0x1bd   :  { %1666 = vmatpush1.bf16.msra.mxu1 %v2587_v52 }
 0x1be   :  { %1667 = vmatprep.subr.bf16.mxu1 %v2592_v53 }
 0x1c1   :  { %1668 = vmatpush1.bf16.msra.mxu1 %v2590_v54 }
 0x1c2   :  { %1669 = vmatprep.subr.bf16.mxu1 %v2595_v55 }
 0x1c5   :  { %1670 = vmatpush1.bf16.msra.mxu1 %v2593_v56 }
 0x1c6   :  { %1671 = vmatprep.subr.bf16.mxu1 %v2598_v57 }
 0x1c9   :  { %1672 = vmatpush1.bf16.msra.mxu1 %v2596_v58 }
 0x1ca   :  { %1673 = vmatprep.subr.bf16.mxu1 %v2601_v59 }
 0x1cd   :  { %1674 = vmatpush1.bf16.msra.mxu1 %v2599_v60 }
 0x1ce   :  { %2280 = vmatprep.subr.bf16.mxu1 %v2674_v1 }
 0x1d0   :  { %1692 = vmatmul.mubr.bf16.vlgmr.msra.gmra.mrb[12].mxu1 %v1315_v28 }
 0x1d1   :  { %2281 = vmatpush3.bf16.msra.mxu1 %v2614_v0  ;;  %2296 = vmatprep.mubr.msk.bf16.mxu1 %vm2675_vm1, %v2674_v1 }
 0x1d2   :  { %2282 = vmatprep.subr.bf16.mxu1 %v2674_v1 }
 0x1d5   :  { %2283 = vmatpush3.bf16.msra.mxu1 %v2615_v2 }
 0x1d6   :  { %2284 = vmatprep.subr.bf16.mxu1 %v2674_v1 }
 0x1d9   :  { %2285 = vmatpush3.bf16.msra.mxu1 %v2616_v3 }
 0x1da   :  { %2286 = vmatprep.subr.bf16.mxu1 %v2674_v1 }
 0x1dd   :  { %2287 = vmatpush3.bf16.msra.mxu1 %v2617_v4 }
 0x1de   :  { %2288 = vmatprep.subr.bf16.mxu1 %v2674_v1 }
 0x1e1   :  { %2289 = vmatpush3.bf16.msra.mxu1 %v2618_v5 }
 0x1e2   :  { %2290 = vmatprep.subr.bf16.mxu1 %v2674_v1 }
 0x1e5   :  { %2291 = vmatpush3.bf16.msra.mxu1 %v2619_v6 }
 0x1e6   :  { %2292 = vmatprep.subr.bf16.mxu1 %v2674_v1 }
 0x1e9   :  { %2293 = vmatpush3.bf16.msra.mxu1 %v2620_v20 }
 0x1ea   :  { %2294 = vmatprep.subr.bf16.mxu1 %v2674_v1 }
 0x1ed   :  { %2295 = vmatpush3.bf16.msra.mxu1 %v2621_v62 }
 0x2a3   :  { %v1693_v9 = vpop.f32.mrb[12].mxu1 }
 0x2a4   :  { %v1695_v11 = vpop.f32.mrb[13].mxu1  ;;  %v2304_v13 = vadd.f32 %v1693_v9, %v1369_v8 }
 0x2a5   :  { %v1697_v12 = vpop.f32.mrb[14].mxu1  ;;  %v2305_v16 = vadd.f32 %v1695_v11, %v1373_v10 }
 0x2a6   :  { %v2306_v14 = vadd.f32 %v1697_v12, %v1369_v8  ;;  %v1699_v15 = vpop.f32.mrb[15].mxu1 }
 0x2a7   :  { %v2307_v17 = vadd.f32 %v1699_v15, %v1373_v10 }
 0x2a8   :  { %v1702_v18 = vpack.c.bf16 %v2306_v14, %v2304_v13 }
 0x2a9   :  { %v1703_v19 = vpack.c.bf16 %v2307_v17, %v2305_v16 }
 0x2ab   :  { %2195 = vmatprep.mubr.msk.bf16.mxu0 %vm1807_vm0, %v1703_v19 }
 0x2ac   :  { %1844 = vmatmul.mubr.bf16.vlgmr.msra.gmra.mrb[4].mxu0 %v1702_v18 }
 0x37f   :  { %v1845_v22 = vpop.f32.mrb[4].mxu0 }
 0x380   :  { %v1847_v23 = vpop.f32.mrb[5].mxu0  ;;  %v1846_v25 = vadd.f32 %v2182_v21, %v1845_v22 }
 0x381   :  { %v1848_v24 = vpop.f32.mrb[6].mxu0 }
 0x382   :  { %v1849_v26 = vadd.f32 %v2182_v21, %v1848_v24  ;;  %v1850_v27 = vpop.f32.mrb[7].mxu0 }
 0x384   :  { %v1852_v28 = vpack.c.bf16 %v1849_v26, %v1846_v25 }
 0x386   :  { %2297 = vmatmul.mubr.bf16.vlgmr.msra.gmra.mrb[16].mxu1 %v1852_v28 }
 0x459   :  { %v1958_v30 = vpop.f32.mrb[16].mxu1 }
 0x45a   :  { %v1959_v31 = vadd.f32 %v2196_v29, %v1958_v30  ;;  %v2298_v32 = vpop.f32.mrb[17].mxu1 }
 0x45b   :  { %v1961_v33 = vpop.f32.mrb[18].mxu1 }
 0x45c   :  { %1965 = vst [vmem:[#allocation5] sm:$0xff] %v1959_v31  ;;  %v1962_v34 = vadd.f32 %v2196_v29, %v1961_v33  ;;  %v2299_v35 = vpop.f32.mrb[19].mxu1 }
 0x45e   :  { %1966 = vst [vmem:[#allocation5 + $0x8] sm:$0xff] %v1962_v34 }
 0x45f   :  { %2655 = shalt.err (!%p2652_p12)
}
 0x460   :  { %s2656_s14 = scalar_lea.hbm %s3036_s9, 256 }
 0x461   :  { %p2657_p13 = scmp.ne.s32.totalorder %s3036_s9, %s2656_s14  ;;  %p2660_p0 = scmp.lt.u32.totalorder %s2656_s14, %s3036_s9 }
 0x463   :  { %p2662_p1 = pnand %p2660_p0, %p2657_p13 }
 0x465   :  { %2665 = shalt.err (!%p2662_p1)
}
 0x466   :  { %s2677_s3 = smov 128   ;;  %s2678_s19 = smov 8  }
 0x467   :  { %1978 = dma.vmem_to_hbm [thread:$0]  %s1973_s13, 256, %s3036_s9, [#allocation4], %s2677_s3, %s2677_s3, %s2678_s19  }
 0x468   :  { %2668 = dma.done.wait [#allocation4], 256  }
 0x469   :  { %2669 = vsyncadd [#allocation4], 4294967040 }
 0x46a   :  { %1982 = vsyncpa [#allocation3], 1 }
 0x46b   :  { %1983 = vsyncpa [#allocation4], 1 }

// kernel: tpu_custom_call.1
= control target key start
LH: loop header
LB: loop body
LE: loop exit
PB: predicated region body
PF: predicated region fallthrough
CT: control target
= control target key end

     0   :  { %14 = vsyncpa [#allocation3], 0  ;;  %s3027_s0 = inlined_call_operand.vmem [shape: bf16[16,768], index: 0, kind: input, shape index: {}]   ;;  %s3028_s1 = inlined_call_operand.hbm [shape: bf16[768,384], index: 1, kind: input, shape index: {}]   ;;  %s3029_s2 = inlined_call_operand.vmem [shape: f32[1,384], index: 2, kind: input, shape index: {}]   ;;  %s3030_s3 = inlined_call_operand.vmem [shape: bf16[384,192], index: 3, kind: input, shape index: {}]   ;;  %s3031_s4 = inlined_call_operand.vmem [shape: f32[1,192], index: 4, kind: input, shape index: {}]   ;;  %s3032_s5 = inlined_call_operand.vmem [shape: bf16[192,128], index: 5, kind: input, shape index: {}]   ;;  %s3033_s6 = inlined_call_operand.vmem [shape: f32[1,128], index: 6, kind: input, shape index: {}]   ;;  %s3034_s7 = inlined_call_operand.vmem [shape: bf16[128,128], index: 7, kind: input, shape index: {}]   ;;  %s3035_s8 = inlined_call_operand.vmem [shape: f32[1,128], index: 8, kind: input, shape index: {}]   ;;  %s3036_s9 = inlined_call_operand.hbm [shape: f32[16,128], index: 9, kind: output, shape index: {}]  }
   0x1   :  { %15 = vsyncpa [#allocation4], 0  ;;  %s2670_s30 = smov [#allocation2]   ;;  %s2622_s13 = scalar_lea.hbm %s3028_s1, 18432 }
   0x2   :  { %s23_s10 = sshll.u32 %s2670_s30, 4  ;;  %p2623_p0 = scmp.ne.s32.totalorder %s3028_s1, %s2622_s13  ;;  %s24_s10 = int_to_ptr.vmem [resolvable:$true] %s23_s10 }
   0x3   :  { %p2626_p1 = scmp.lt.u32.totalorder %s2622_s13, %s3028_s1 }
   0x5   :  { %p2628_p2 = pnand %p2626_p1, %p2623_p0 }
   0x7   :  { %2631 = shalt.err (!%p2628_p2)
}
   0x8   :  { %s2632_s18 = scalar_lea.vmem %s24_s10, 18432  ;;  %p2637_p4 = scmp.lt.s32.totalorder %s24_s10, %s24_s10 }
   0x9   :  { %p2633_p3 = scmp.ne.s32.totalorder %s24_s10, %s2632_s18  ;;  %p2638_p5 = scmp.lt.s32.totalorder %s2632_s18, %s2632_s18 }
   0xb   :  { %p2639_p6 = por %p2638_p5, %p2637_p4 }
   0xd   :  { %p2640_p7 = pnand %p2639_p6, %p2633_p3 }
   0xf   :  { %2643 = shalt.err (!%p2640_p7)
}
  0x10   :  { %s2671_s19 = smov 192   ;;  %s2672_s20 = smov 12  }
  0x11   :  { %29 = dma.hbm_to_vmem [thread:$0]  %s3028_s1, 18432, %s24_s10, [#allocation3], %s2671_s19, %s2671_s19, %s2672_s20  }
  0x12   :  { %2666 = dma.done.wait [#allocation3], 18432  }
  0x13   :  { %2667 = vsyncadd [#allocation3], 4294948864  ;;  %v2329_v0 = vld [vmem:[#allocation2 + $0x4] ss:$12 sps:$4 sm:$0xff]   ;;  %v2331_v1 = vld [vmem:[#allocation2] ss:$12 sps:$4 sm:$0xff]  }
  0x14   :  { %1061 = vmatprep.subr.bf16.mxu0 %v2329_v0  ;;  %v2332_v2 = vld [vmem:[#allocation2 + $0x1c] ss:$12 sps:$4 sm:$0xff]   ;;  %v2334_v3 = vld [vmem:[#allocation2 + $0x18] ss:$12 sps:$4 sm:$0xff]   ;;  %v2335_v4 = vld [vmem:[#allocation2 + $0x34] ss:$12 sps:$4 sm:$0xff]  }
  0x15   :  { %1062 = vmatpush1.bf16.msra.mxu0 %v2331_v1  ;;  %v2337_v5 = vld [vmem:[#allocation2 + $0x30] ss:$12 sps:$4 sm:$0xff]   ;;  %v2338_v6 = vld [vmem:[#allocation2 + $0x4c] ss:$12 sps:$4 sm:$0xff]   ;;  %v2340_v7 = vld [vmem:[#allocation2 + $0x48] ss:$12 sps:$4 sm:$0xff]  }
  0x16   :  { %1063 = vmatprep.subr.bf16.mxu0 %v2332_v2  ;;  %v2341_v8 = vld [vmem:[#allocation2 + $0x64] ss:$12 sps:$4 sm:$0xff]   ;;  %v2343_v9 = vld [vmem:[#allocation2 + $0x60] ss:$12 sps:$4 sm:$0xff]   ;;  %v2344_v10 = vld [vmem:[#allocation2 + $0x7c] ss:$12 sps:$4 sm:$0xff]  }
  0x17   :  { %v2346_v11 = vld [vmem:[#allocation2 + $0x78] ss:$12 sps:$4 sm:$0xff]   ;;  %v2347_v12 = vld [vmem:[#allocation2 + $0x94] ss:$12 sps:$4 sm:$0xff]   ;;  %v2349_v14 = vld [vmem:[#allocation2 + $0x90] ss:$12 sps:$4 sm:$0xff]  }
  0x18   :  { %v2379_v13 = vld [vmem:[%s3027_s0 + $0x4] ss:$24 sps:$4 sm:$0xff]   ;;  %v2350_v15 = vld [vmem:[#allocation2 + $0xac] ss:$12 sps:$4 sm:$0xff]   ;;  %v2383_v16 = vld [vmem:[#allocation2 + $0xc8] ss:$12 sps:$4 sm:$0xff]  }
  0x19   :  { %1064 = vmatpush1.bf16.msra.mxu0 %v2334_v3  ;;  %1093 = vmatprep.mubr.bf16.mxu0 %v2379_v13  ;;  %v2384_v17 = vld [vmem:[#allocation2 + $0x8] ss:$12 sps:$4 sm:$0xff]   ;;  %v2353_v19 = vld [vmem:[#allocation2 + $0xc4] ss:$12 sps:$4 sm:$0xff]   ;;  %v2388_v20 = vld [vmem:[#allocation2 + $0xe0] ss:$12 sps:$4 sm:$0xff]  }
  0x1a   :  { %1065 = vmatprep.subr.bf16.mxu0 %v2335_v4  ;;  %1222 = vmatprep.mubr.bf16.mxu1 %v2379_v13  ;;  %v2352_v18 = vld [vmem:[#allocation2 + $0xa8] ss:$12 sps:$4 sm:$0xff]   ;;  %v2389_v21 = vld [vmem:[#allocation2 + $0x20] ss:$12 sps:$4 sm:$0xff]   ;;  %v2393_v24 = vld [vmem:[#allocation2 + $0xf8] ss:$12 sps:$4 sm:$0xff]  }
  0x1b   :  { %2205 = vmatprep.subr.bf16.mxu1 %v2383_v16  ;;  %v2355_v22 = vld [vmem:[#allocation2 + $0xc0] ss:$12 sps:$4 sm:$0xff]   ;;  %v2356_v23 = vld [vmem:[#allocation2 + $0xdc] ss:$12 sps:$4 sm:$0xff]   ;;  %v2394_v25 = vld [vmem:[#allocation2 + $0x38] ss:$12 sps:$4 sm:$0xff]  }
  0x1c   :  { %2206 = vmatpush3.bf16.msra.mxu1 %v2384_v17  ;;  %v2358_v26 = vld [vmem:[#allocation2 + $0xd8] ss:$12 sps:$4 sm:$0xff]   ;;  %v2398_v27 = vld [vmem:[#allocation2 + $0x110] ss:$12 sps:$4 sm:$0xff]   ;;  %v2359_v29 = vld [vmem:[#allocation2 + $0xf4] ss:$12 sps:$4 sm:$0xff]  }
  0x1d   :  { %1066 = vmatpush1.bf16.msra.mxu0 %v2337_v5  ;;  %2207 = vmatprep.subr.bf16.mxu1 %v2388_v20  ;;  %v2399_v28 = vld [vmem:[#allocation2 + $0x50] ss:$12 sps:$4 sm:$0xff]   ;;  %v2403_v31 = vld [vmem:[#allocation2 + $0x128] ss:$12 sps:$4 sm:$0xff]   ;;  %v2362_v33 = vld [vmem:[#allocation2 + $0x10c] ss:$12 sps:$4 sm:$0xff]  }
  0x1e   :  { %1067 = vmatprep.subr.bf16.mxu0 %v2338_v6  ;;  %v2361_v30 = vld [vmem:[#allocation2 + $0xf0] ss:$12 sps:$4 sm:$0xff]   ;;  %v2404_v32 = vld [vmem:[#allocation2 + $0x68] ss:$12 sps:$4 sm:$0xff]   ;;  %v2408_v34 = vld [vmem:[#allocation2 + $0x140] ss:$12 sps:$4 sm:$0xff]  }
  0x1f   :  { %v2364_v35 = vld [vmem:[#allocation2 + $0x108] ss:$12 sps:$4 sm:$0xff]   ;;  %v2365_v36 = vld [vmem:[#allocation2 + $0x124] ss:$12 sps:$4 sm:$0xff]   ;;  %v2409_v37 = vld [vmem:[#allocation2 + $0x80] ss:$12 sps:$4 sm:$0xff]  }
  0x20   :  { %2208 = vmatpush3.bf16.msra.mxu1 %v2389_v21  ;;  %v2413_v38 = vld [vmem:[#allocation2 + $0x158] ss:$12 sps:$4 sm:$0xff]   ;;  %v2367_v39 = vld [vmem:[#allocation2 + $0x120] ss:$12 sps:$4 sm:$0xff]   ;;  %v2368_v40 = vld [vmem:[#allocation2 + $0x13c] ss:$12 sps:$4 sm:$0xff]  }
  0x21   :  { %1068 = vmatpush1.bf16.msra.mxu0 %v2340_v7  ;;  %2209 = vmatprep.subr.bf16.mxu1 %v2393_v24  ;;  %v2414_v41 = vld [vmem:[#allocation2 + $0x98] ss:$12 sps:$4 sm:$0xff]   ;;  %v2418_v42 = vld [vmem:[#allocation2 + $0x170] ss:$12 sps:$4 sm:$0xff]   ;;  %v2371_v44 = vld [vmem:[#allocation2 + $0x154] ss:$12 sps:$4 sm:$0xff]  }
  0x22   :  { %1069 = vmatprep.subr.bf16.mxu0 %v2341_v8  ;;  %v2370_v43 = vld [vmem:[#allocation2 + $0x138] ss:$12 sps:$4 sm:$0xff]   ;;  %v2419_v45 = vld [vmem:[#allocation2 + $0xb0] ss:$12 sps:$4 sm:$0xff]   ;;  %v2423_v46 = vld [vmem:[#allocation2 + $0x248] ss:$12 sps:$4 sm:$0xff]  }
  0x23   :  { %v2373_v47 = vld [vmem:[#allocation2 + $0x150] ss:$12 sps:$4 sm:$0xff]   ;;  %v2374_v48 = vld [vmem:[#allocation2 + $0x16c] ss:$12 sps:$4 sm:$0xff]   ;;  %v2424_v50 = vld [vmem:[#allocation2 + $0x188] ss:$12 sps:$4 sm:$0xff]  }
  0x24   :  { %2210 = vmatpush3.bf16.msra.mxu1 %v2394_v25  ;;  %v2377_v49 = vld [vmem:[%s3027_s0] ss:$24 sps:$4 sm:$0xff]   ;;  %v2376_v52 = vld [vmem:[#allocation2 + $0x168] ss:$12 sps:$4 sm:$0xff]   ;;  %v2382_v54 = vld [vmem:[#allocation2 + $0x184] ss:$12 sps:$4 sm:$0xff]  }
  0x25   :  { %1070 = vmatpush1.bf16.msra.mxu0 %v2343_v9  ;;  %2211 = vmatprep.subr.bf16.mxu1 %v2398_v27  ;;  %v2428_v51 = vld [vmem:[#allocation2 + $0x260] ss:$12 sps:$4 sm:$0xff]   ;;  %v2433_v55 = vld [vmem:[#allocation2 + $0x278] ss:$12 sps:$4 sm:$0xff]   ;;  %v2387_v57 = vld [vmem:[#allocation2 + $0x19c] ss:$12 sps:$4 sm:$0xff]  }
  0x26   :  { %1071 = vmatprep.subr.bf16.mxu0 %v2344_v10  ;;  %v2429_v53 = vld [vmem:[#allocation2 + $0x1a0] ss:$12 sps:$4 sm:$0xff]   ;;  %v2434_v58 = vld [vmem:[#allocation2 + $0x1b8] ss:$12 sps:$4 sm:$0xff]   ;;  %v2438_v59 = vld [vmem:[#allocation2 + $0x290] ss:$12 sps:$4 sm:$0xff]  }
  0x27   :  { %v2380_v56 = vld [vmem:[#allocation2 + $0x180] ss:$12 sps:$4 sm:$0xff]   ;;  %v2385_v60 = vld [vmem:[#allocation2 + $0x198] ss:$12 sps:$4 sm:$0xff]   ;;  %v2439_v62 = vld [vmem:[#allocation2 + $0x1d0] ss:$12 sps:$4 sm:$0xff]  }
  0x28   :  { %2212 = vmatpush3.bf16.msra.mxu1 %v2399_v28  ;;  %v2392_v61 = vld [vmem:[#allocation2 + $0x1b4] ss:$12 sps:$4 sm:$0xff]   ;;  %v2390_v0 = vld [vmem:[#allocation2 + $0x1b0] ss:$12 sps:$4 sm:$0xff]   ;;  %v2397_v1 = vld [vmem:[#allocation2 + $0x1cc] ss:$12 sps:$4 sm:$0xff]  }
  0x29   :  { %1072 = vmatpush1.bf16.msra.mxu0 %v2346_v11  ;;  %2213 = vmatprep.subr.bf16.mxu1 %v2403_v31  ;;  %v2443_v63 = vld [vmem:[#allocation2 + $0x2a8] ss:$12 sps:$4 sm:$0xff]   ;;  %v2448_v3 = vld [vmem:[#allocation2 + $0x2c0] ss:$12 sps:$4 sm:$0xff]   ;;  %v2402_v5 = vld [vmem:[#allocation2 + $0x1e4] ss:$12 sps:$4 sm:$0xff]  }
  0x2a   :  { %1073 = vmatprep.subr.bf16.mxu0 %v2347_v12  ;;  %v2444_v2 = vld [vmem:[#allocation2 + $0x1e8] ss:$12 sps:$4 sm:$0xff]   ;;  %v2449_v6 = vld [vmem:[#allocation2 + $0x200] ss:$12 sps:$4 sm:$0xff]   ;;  %v2453_v7 = vld [vmem:[#allocation2 + $0x2d8] ss:$12 sps:$4 sm:$0xff]  }
  0x2b   :  { %v2395_v4 = vld [vmem:[#allocation2 + $0x1c8] ss:$12 sps:$4 sm:$0xff]   ;;  %v2462_v8 = vld [vmem:[%s3027_s0 + $0xc] ss:$24 sps:$4 sm:$0xff]   ;;  %v2458_v12 = vld [vmem:[#allocation2 + $0x2f0] ss:$12 sps:$4 sm:$0xff]  }
  0x2c   :  { %2214 = vmatpush3.bf16.msra.mxu1 %v2404_v32  ;;  %v2400_v9 = vld [vmem:[#allocation2 + $0x1e0] ss:$12 sps:$4 sm:$0xff]   ;;  %v2407_v10 = vld [vmem:[#allocation2 + $0x1fc] ss:$12 sps:$4 sm:$0xff]   ;;  %v2454_v11 = vld [vmem:[#allocation2 + $0x218] ss:$12 sps:$4 sm:$0xff]  }
  0x2d   :  { %1074 = vmatpush1.bf16.msra.mxu0 %v2349_v14  ;;  %2215 = vmatprep.subr.bf16.mxu1 %v2408_v34  ;;  %v2405_v13 = vld [vmem:[#allocation2 + $0x1f8] ss:$12 sps:$4 sm:$0xff]   ;;  %v2412_v14 = vld [vmem:[#allocation2 + $0x214] ss:$12 sps:$4 sm:$0xff]   ;;  %v2410_v17 = vld [vmem:[#allocation2 + $0x210] ss:$12 sps:$4 sm:$0xff]  }
  0x2e   :  { %1075 = vmatprep.subr.bf16.mxu0 %v2350_v15  ;;  %v2459_v15 = vld [vmem:[#allocation2 + $0x230] ss:$12 sps:$4 sm:$0xff]   ;;  %v2466_v16 = vld [vmem:[#allocation2 + $0x3c8] ss:$12 sps:$4 sm:$0xff]   ;;  %v2417_v20 = vld [vmem:[#allocation2 + $0x22c] ss:$12 sps:$4 sm:$0xff]  }
  0x2f   :  { %v2471_v21 = vld [vmem:[#allocation2 + $0x3e0] ss:$12 sps:$4 sm:$0xff]   ;;  %v2476_v25 = vld [vmem:[#allocation2 + $0x3f8] ss:$12 sps:$4 sm:$0xff]   ;;  %v2427_v27 = vld [vmem:[#allocation2 + $0x25c] ss:$12 sps:$4 sm:$0xff]  }
  0x30   :  { %2216 = vmatpush3.bf16.msra.mxu1 %v2409_v37  ;;  %v2472_v24 = vld [vmem:[#allocation2 + $0x320] ss:$12 sps:$4 sm:$0xff]   ;;  %v2477_v28 = vld [vmem:[#allocation2 + $0x338] ss:$12 sps:$4 sm:$0xff]   ;;  %v2482_v32 = vld [vmem:[#allocation2 + $0x350] ss:$12 sps:$4 sm:$0xff]  }
  0x31   :  { %1076 = vmatpush1.bf16.msra.mxu0 %v2352_v18  ;;  %2217 = vmatprep.subr.bf16.mxu1 %v2413_v38  ;;  %v2753_v18 = vld [vmem:[%s3027_s0 + $0x8] ss:$24 sps:$4 sm:$0xff]   ;;  %v2430_v34 = vld [vmem:[#allocation2 + $0x270] ss:$12 sps:$4 sm:$0xff]   ;;  %v2505_v38 = vld [vmem:[%s3027_s0 + $0x14] ss:$24 sps:$4 sm:$0xff]  }
  0x32   :  { %1077 = vmatprep.subr.bf16.mxu0 %v2353_v19  ;;  %v2467_v19 = vld [vmem:[#allocation2 + $0x308] ss:$12 sps:$4 sm:$0xff]   ;;  %v2491_v37 = vld [vmem:[#allocation2 + $0x440] ss:$12 sps:$4 sm:$0xff]   ;;  %vm1807_vm0 = vcmask 523264   ;;  %vm2675_vm1 = vmmov 0  }
  0x33   :  { %v2432_v31 = vld [vmem:[#allocation2 + $0x274] ss:$12 sps:$4 sm:$0xff]  }
  0x34   :  { %2218 = vmatpush3.bf16.msra.mxu1 %v2414_v41  ;;  %v2492_v41 = vld [vmem:[#allocation2 + $0x380] ss:$12 sps:$4 sm:$0xff]  }
  0x35   :  { %1078 = vmatpush1.bf16.msra.mxu0 %v2355_v22  ;;  %2219 = vmatprep.subr.bf16.mxu1 %v2418_v42  ;;  %v2415_v22 = vld [vmem:[#allocation2 + $0x228] ss:$12 sps:$4 sm:$0xff]   ;;  %v2496_v42 = vld [vmem:[#allocation2 + $0x458] ss:$12 sps:$4 sm:$0xff]  }
  0x36   :  { %1079 = vmatprep.subr.bf16.mxu0 %v2356_v23  ;;  %v2422_v23 = vld [vmem:[#allocation2 + $0x244] ss:$12 sps:$4 sm:$0xff]  }
  0x38   :  { %2220 = vmatpush3.bf16.msra.mxu1 %v2419_v45  ;;  %v2497_v45 = vld [vmem:[#allocation2 + $0x398] ss:$12 sps:$4 sm:$0xff]  }
  0x39   :  { %1080 = vmatpush1.bf16.msra.mxu0 %v2358_v26  ;;  %2227 = vmatprep.subr.bf16.mxu1 %v2423_v46  ;;  %v2420_v26 = vld [vmem:[#allocation2 + $0x240] ss:$12 sps:$4 sm:$0xff]   ;;  %v2501_v46 = vld [vmem:[#allocation2 + $0x470] ss:$12 sps:$4 sm:$0xff]  }
  0x3a   :  { %1081 = vmatprep.subr.bf16.mxu0 %v2359_v29  ;;  %v2481_v29 = vld [vmem:[#allocation2 + $0x410] ss:$12 sps:$4 sm:$0xff]  }
  0x3b   :  { %1223 = vmatmul.mubr.bf16.vlgmr.msra.gmra.mrb[0].mxu1 %v2377_v49 }
  0x3c   :  { %2228 = vmatpush3.bf16.msra.mxu1 %v2424_v50  ;;  %1263 = vmatprep.mubr.bf16.mxu1 %v2462_v8  ;;  %v2532_v50 = vld [vmem:[%s3030_s3 + $0x4] ss:$8 sps:$4 sm:$0xff]  }
  0x3d   :  { %1082 = vmatpush1.bf16.msra.mxu0 %v2361_v30  ;;  %2229 = vmatprep.subr.bf16.mxu1 %v2428_v51  ;;  %v2425_v30 = vld [vmem:[#allocation2 + $0x258] ss:$12 sps:$4 sm:$0xff]   ;;  %v2450_v51 = vld [vmem:[#allocation2 + $0x2d0] ss:$12 sps:$4 sm:$0xff]  }
  0x3e   :  { %1083 = vmatprep.subr.bf16.mxu0 %v2362_v33  ;;  %v2486_v33 = vld [vmem:[#allocation2 + $0x428] ss:$12 sps:$4 sm:$0xff]  }
  0x40   :  { %2230 = vmatpush3.bf16.msra.mxu1 %v2429_v53  ;;  %v2457_v53 = vld [vmem:[#allocation2 + $0x2ec] ss:$12 sps:$4 sm:$0xff]  }
  0x41   :  { %1084 = vmatpush1.bf16.msra.mxu0 %v2364_v35  ;;  %2231 = vmatprep.subr.bf16.mxu1 %v2433_v55  ;;  %v2437_v35 = vld [vmem:[#allocation2 + $0x28c] ss:$12 sps:$4 sm:$0xff]   ;;  %v2535_v55 = vld [vmem:[%s3030_s3 + $0x14] ss:$8 sps:$4 sm:$0xff]  }
  0x42   :  { %1085 = vmatprep.subr.bf16.mxu0 %v2365_v36  ;;  %v2487_v36 = vld [vmem:[#allocation2 + $0x368] ss:$12 sps:$4 sm:$0xff]  }
  0x44   :  { %2232 = vmatpush3.bf16.msra.mxu1 %v2434_v58  ;;  %v2465_v58 = vld [vmem:[#allocation2 + $0x304] ss:$12 sps:$4 sm:$0xff]  }
  0x45   :  { %1086 = vmatpush1.bf16.msra.mxu0 %v2367_v39  ;;  %2233 = vmatprep.subr.bf16.mxu1 %v2438_v59  ;;  %v2435_v39 = vld [vmem:[#allocation2 + $0x288] ss:$12 sps:$4 sm:$0xff]   ;;  %v2538_v59 = vld [vmem:[%s3030_s3 + $0x24] ss:$8 sps:$4 sm:$0xff]  }
  0x46   :  { %1087 = vmatprep.subr.bf16.mxu0 %v2368_v40  ;;  %v2442_v40 = vld [vmem:[#allocation2 + $0x2a4] ss:$12 sps:$4 sm:$0xff]  }
  0x48   :  { %2234 = vmatpush3.bf16.msra.mxu1 %v2439_v62  ;;  %v2536_v62 = vld [vmem:[%s3030_s3 + $0x20] ss:$8 sps:$4 sm:$0xff]  }
  0x49   :  { %1088 = vmatpush1.bf16.msra.mxu0 %v2370_v43  ;;  %2235 = vmatprep.subr.bf16.mxu1 %v2443_v63  ;;  %v2440_v43 = vld [vmem:[#allocation2 + $0x2a0] ss:$12 sps:$4 sm:$0xff]   ;;  %v2541_v63 = vld [vmem:[%s3030_s3 + $0x34] ss:$8 sps:$4 sm:$0xff]  }
  0x4a   :  { %1089 = vmatprep.subr.bf16.mxu0 %v2371_v44  ;;  %v2447_v44 = vld [vmem:[#allocation2 + $0x2bc] ss:$12 sps:$4 sm:$0xff]  }
  0x4c   :  { %2236 = vmatpush3.bf16.msra.mxu1 %v2444_v2  ;;  %v2539_v2 = vld [vmem:[%s3030_s3 + $0x30] ss:$8 sps:$4 sm:$0xff]  }
  0x4d   :  { %1090 = vmatpush1.bf16.msra.mxu0 %v2373_v47  ;;  %2237 = vmatprep.subr.bf16.mxu1 %v2448_v3  ;;  %v2445_v47 = vld [vmem:[#allocation2 + $0x2b8] ss:$12 sps:$4 sm:$0xff]   ;;  %v2473_v3 = vld [vmem:[#allocation2 + $0x330] ss:$12 sps:$4 sm:$0xff]  }
  0x4e   :  { %1091 = vmatprep.subr.bf16.mxu0 %v2374_v48  ;;  %v2502_v48 = vld [vmem:[#allocation2 + $0x3b0] ss:$12 sps:$4 sm:$0xff]  }
  0x50   :  { %2238 = vmatpush3.bf16.msra.mxu1 %v2449_v6  ;;  %v2485_v6 = vld [vmem:[#allocation2 + $0x364] ss:$12 sps:$4 sm:$0xff]  }
  0x51   :  { %1092 = vmatpush1.bf16.msra.mxu0 %v2376_v52  ;;  %2239 = vmatprep.subr.bf16.mxu1 %v2453_v7  ;;  %v2765_v52 = vld [vmem:[%s3027_s0 + $0x10] ss:$24 sps:$4 sm:$0xff]   ;;  %v2483_v7 = vld [vmem:[#allocation2 + $0x360] ss:$12 sps:$4 sm:$0xff]  }
  0x52   :  { %1104 = vmatprep.subr.bf16.mxu0 %v2382_v54  ;;  %v2530_v54 = vld [vmem:[%s3030_s3] ss:$8 sps:$4 sm:$0xff]  }
  0x54   :  { %1094 = vmatmul.mubr.bf16.vlgmr.msra.gmra.mrb[0].mxu0 %v2377_v49  ;;  %2240 = vmatpush3.bf16.msra.mxu1 %v2454_v11  ;;  %v2452_v49 = vld [vmem:[#allocation2 + $0x2d4] ss:$12 sps:$4 sm:$0xff]   ;;  %v2488_v11 = vld [vmem:[#allocation2 + $0x378] ss:$12 sps:$4 sm:$0xff]  }
  0x55   :  { %1105 = vmatpush1.bf16.msra.mxu0 %v2380_v56  ;;  %1136 = vmatprep.mubr.bf16.mxu0 %v2462_v8  ;;  %v2455_v56 = vld [vmem:[#allocation2 + $0x2e8] ss:$12 sps:$4 sm:$0xff]  }
  0x56   :  { %1106 = vmatprep.subr.bf16.mxu0 %v2387_v57  ;;  %2241 = vmatprep.subr.bf16.mxu1 %v2458_v12  ;;  %v2533_v57 = vld [vmem:[%s3030_s3 + $0x10] ss:$8 sps:$4 sm:$0xff]   ;;  %v2542_v8 = vld [vmem:[%s3030_s3 + $0x40] ss:$8 sps:$4 sm:$0xff]  }
  0x57   :  { %v2495_v12 = vld [vmem:[#allocation2 + $0x394] ss:$12 sps:$4 sm:$0xff]  }
  0x58   :  { %2242 = vmatpush3.bf16.msra.mxu1 %v2459_v15  ;;  %v2498_v15 = vld [vmem:[#allocation2 + $0x3a8] ss:$12 sps:$4 sm:$0xff]  }
  0x59   :  { %1107 = vmatpush1.bf16.msra.mxu0 %v2385_v60  ;;  %2249 = vmatprep.subr.bf16.mxu1 %v2466_v16  ;;  %v2463_v60 = vld [vmem:[#allocation2 + $0x300] ss:$12 sps:$4 sm:$0xff]   ;;  %v2508_v16 = vld [vmem:[#allocation2 + $0x3c4] ss:$12 sps:$4 sm:$0xff]  }
  0x5a   :  { %1108 = vmatprep.subr.bf16.mxu0 %v2392_v61  ;;  %v2470_v61 = vld [vmem:[#allocation2 + $0x31c] ss:$12 sps:$4 sm:$0xff]  }
  0x5b   :  { %1264 = vmatmul.mubr.bf16.vlgmr.msra.gmra.mrb[4].mxu1 %v2753_v18 }
  0x5c   :  { %2250 = vmatpush3.bf16.msra.mxu1 %v2467_v19  ;;  %1304 = vmatprep.mubr.bf16.mxu1 %v2505_v38  ;;  %v2509_v19 = vld [vmem:[#allocation2 + $0x3d8] ss:$12 sps:$4 sm:$0xff]  }
  0x5d   :  { %1109 = vmatpush1.bf16.msra.mxu0 %v2390_v0  ;;  %2251 = vmatprep.subr.bf16.mxu1 %v2471_v21  ;;  %v2468_v0 = vld [vmem:[#allocation2 + $0x318] ss:$12 sps:$4 sm:$0xff]   ;;  %v2512_v21 = vld [vmem:[#allocation2 + $0x3f0] ss:$12 sps:$4 sm:$0xff]  }
  0x5e   :  { %1110 = vmatprep.subr.bf16.mxu0 %v2397_v1  ;;  %v2475_v1 = vld [vmem:[#allocation2 + $0x334] ss:$12 sps:$4 sm:$0xff]  }
  0x60   :  { %2252 = vmatpush3.bf16.msra.mxu1 %v2472_v24  ;;  %v2520_v24 = vld [vmem:[#allocation2 + $0x424] ss:$12 sps:$4 sm:$0xff]  }
  0x61   :  { %1111 = vmatpush1.bf16.msra.mxu0 %v2395_v4  ;;  %2253 = vmatprep.subr.bf16.mxu1 %v2476_v25  ;;  %v2480_v4 = vld [vmem:[#allocation2 + $0x34c] ss:$12 sps:$4 sm:$0xff]  }
  0x62   :  { %1112 = vmatprep.subr.bf16.mxu0 %v2402_v5  ;;  %v2478_v5 = vld [vmem:[#allocation2 + $0x348] ss:$12 sps:$4 sm:$0xff]   ;;  %v2545_v25 = vld [vmem:[%s3030_s3 + $0x50] ss:$8 sps:$4 sm:$0xff]  }
  0x64   :  { %2254 = vmatpush3.bf16.msra.mxu1 %v2477_v28  ;;  %v2523_v28 = vld [vmem:[#allocation2 + $0x43c] ss:$12 sps:$4 sm:$0xff]  }
  0x65   :  { %1113 = vmatpush1.bf16.msra.mxu0 %v2400_v9  ;;  %2255 = vmatprep.subr.bf16.mxu1 %v2481_v29  ;;  %v2544_v9 = vld [vmem:[%s3030_s3 + $0x44] ss:$8 sps:$4 sm:$0xff]  }
  0x66   :  { %1114 = vmatprep.subr.bf16.mxu0 %v2407_v10  ;;  %v2490_v10 = vld [vmem:[#allocation2 + $0x37c] ss:$12 sps:$4 sm:$0xff]   ;;  %v2521_v29 = vld [vmem:[#allocation2 + $0x438] ss:$12 sps:$4 sm:$0xff]  }
  0x68   :  { %2256 = vmatpush3.bf16.msra.mxu1 %v2482_v32  ;;  %v2529_v32 = vld [vmem:[#allocation2 + $0x46c] ss:$12 sps:$4 sm:$0xff]  }
  0x69   :  { %1115 = vmatpush1.bf16.msra.mxu0 %v2405_v13  ;;  %2257 = vmatprep.subr.bf16.mxu1 %v2486_v33  ;;  %v2493_v13 = vld [vmem:[#allocation2 + $0x390] ss:$12 sps:$4 sm:$0xff]   ;;  %v2527_v33 = vld [vmem:[#allocation2 + $0x468] ss:$12 sps:$4 sm:$0xff]  }
  0x6a   :  { %1116 = vmatprep.subr.bf16.mxu0 %v2412_v14  ;;  %v2500_v14 = vld [vmem:[#allocation2 + $0x3ac] ss:$12 sps:$4 sm:$0xff]  }
  0x6c   :  { %2258 = vmatpush3.bf16.msra.mxu1 %v2487_v36  ;;  %v2551_v36 = vld [vmem:[%s3030_s3 + $0x70] ss:$8 sps:$4 sm:$0xff]  }
  0x6d   :  { %1117 = vmatpush1.bf16.msra.mxu0 %v2410_v17  ;;  %2259 = vmatprep.subr.bf16.mxu1 %v2491_v37  ;;  %v2506_v17 = vld [vmem:[#allocation2 + $0x3c0] ss:$12 sps:$4 sm:$0xff]   ;;  %v2553_v37 = vld [vmem:[%s3030_s3 + $0x74] ss:$8 sps:$4 sm:$0xff]  }
  0x6e   :  { %1118 = vmatprep.subr.bf16.mxu0 %v2417_v20  ;;  %v2514_v20 = vld [vmem:[#allocation2 + $0x3f4] ss:$12 sps:$4 sm:$0xff]  }
  0x70   :  { %2260 = vmatpush3.bf16.msra.mxu1 %v2492_v41  ;;  %v2557_v41 = vld [vmem:[%s3030_s3 + $0x90] ss:$8 sps:$4 sm:$0xff]  }
  0x71   :  { %1119 = vmatpush1.bf16.msra.mxu0 %v2415_v22  ;;  %2261 = vmatprep.subr.bf16.mxu1 %v2496_v42  ;;  %v2517_v22 = vld [vmem:[#allocation2 + $0x40c] ss:$12 sps:$4 sm:$0xff]  }
  0x72   :  { %1120 = vmatprep.subr.bf16.mxu0 %v2422_v23  ;;  %v2515_v23 = vld [vmem:[#allocation2 + $0x408] ss:$12 sps:$4 sm:$0xff]   ;;  %v2562_v42 = vld [vmem:[%s3030_s3 + $0xa4] ss:$8 sps:$4 sm:$0xff]  }
  0x74   :  { %2262 = vmatpush3.bf16.msra.mxu1 %v2497_v45  ;;  %v2563_v45 = vld [vmem:[%s3030_s3 + $0xb0] ss:$8 sps:$4 sm:$0xff]  }
  0x75   :  { %1121 = vmatpush1.bf16.msra.mxu0 %v2420_v26  ;;  %2263 = vmatprep.subr.bf16.mxu1 %v2501_v46  ;;  %v2547_v26 = vld [vmem:[%s3030_s3 + $0x54] ss:$8 sps:$4 sm:$0xff]   ;;  %v2568_v46 = vld [vmem:[%s3030_s3 + $0xc4] ss:$8 sps:$4 sm:$0xff]  }
  0x76   :  { %1122 = vmatprep.subr.bf16.mxu0 %v2427_v27  ;;  %v2518_v27 = vld [vmem:[#allocation2 + $0x420] ss:$12 sps:$4 sm:$0xff]  }
  0x78   :  { %2264 = vmatpush3.bf16.msra.mxu1 %v2502_v48  ;;  %v2571_v48 = vld [vmem:[%s3030_s3 + $0xd4] ss:$8 sps:$4 sm:$0xff]  }
  0x79   :  { %1123 = vmatpush1.bf16.msra.mxu0 %v2425_v30  ;;  %1616 = vmatprep.subr.bf16.mxu1 %v2532_v50  ;;  %v2526_v30 = vld [vmem:[#allocation2 + $0x454] ss:$12 sps:$4 sm:$0xff]  }
  0x7a   :  { %1124 = vmatprep.subr.bf16.mxu0 %v2432_v31  ;;  %v2524_v31 = vld [vmem:[#allocation2 + $0x450] ss:$12 sps:$4 sm:$0xff]  }
  0x7b   :  { %1305 = vmatmul.mubr.bf16.vlgmr.msra.gmra.mrb[8].mxu1 %v2765_v52 }
  0x7c   :  { %1617 = vmatpush1.bf16.msra.mxu1 %v2530_v54 }
  0x7d   :  { %1125 = vmatpush1.bf16.msra.mxu0 %v2430_v34  ;;  %1618 = vmatprep.subr.bf16.mxu1 %v2535_v55  ;;  %v2548_v34 = vld [vmem:[%s3030_s3 + $0x60] ss:$8 sps:$4 sm:$0xff]  }
  0x7e   :  { %1126 = vmatprep.subr.bf16.mxu0 %v2437_v35  ;;  %v2550_v35 = vld [vmem:[%s3030_s3 + $0x64] ss:$8 sps:$4 sm:$0xff]  }
  0x80   :  { %1619 = vmatpush1.bf16.msra.mxu1 %v2533_v57  ;;  %v2572_v57 = vld [vmem:[%s3030_s3 + $0xe0] ss:$8 sps:$4 sm:$0xff]  }
  0x81   :  { %1127 = vmatpush1.bf16.msra.mxu0 %v2435_v39  ;;  %1620 = vmatprep.subr.bf16.mxu1 %v2538_v59  ;;  %v2554_v39 = vld [vmem:[%s3030_s3 + $0x80] ss:$8 sps:$4 sm:$0xff]   ;;  %v2575_v59 = vld [vmem:[%s3030_s3 + $0xf0] ss:$8 sps:$4 sm:$0xff]  }
  0x82   :  { %1128 = vmatprep.subr.bf16.mxu0 %v2442_v40  ;;  %v2559_v40 = vld [vmem:[%s3030_s3 + $0x94] ss:$8 sps:$4 sm:$0xff]  }
  0x84   :  { %1621 = vmatpush1.bf16.msra.mxu1 %v2536_v62 }
  0x85   :  { %1129 = vmatpush1.bf16.msra.mxu0 %v2440_v43  ;;  %1622 = vmatprep.subr.bf16.mxu1 %v2541_v63  ;;  %v2560_v43 = vld [vmem:[%s3030_s3 + $0xa0] ss:$8 sps:$4 sm:$0xff]  }
  0x86   :  { %1130 = vmatprep.subr.bf16.mxu0 %v2447_v44  ;;  %v2565_v44 = vld [vmem:[%s3030_s3 + $0xb4] ss:$8 sps:$4 sm:$0xff]  }
  0x88   :  { %1623 = vmatpush1.bf16.msra.mxu1 %v2539_v2 }
  0x89   :  { %1131 = vmatpush1.bf16.msra.mxu0 %v2445_v47  ;;  %1624 = vmatprep.subr.bf16.mxu1 %v2544_v9  ;;  %v2566_v47 = vld [vmem:[%s3030_s3 + $0xc0] ss:$8 sps:$4 sm:$0xff]  }
  0x8a   :  { %1132 = vmatprep.subr.bf16.mxu0 %v2452_v49  ;;  %v2569_v49 = vld [vmem:[%s3030_s3 + $0xd0] ss:$8 sps:$4 sm:$0xff]  }
  0x8c   :  { %1625 = vmatpush1.bf16.msra.mxu1 %v2542_v8 }
  0x8d   :  { %1133 = vmatpush1.bf16.msra.mxu0 %v2450_v51  ;;  %1626 = vmatprep.subr.bf16.mxu1 %v2547_v26 }
  0x8e   :  { %1134 = vmatprep.subr.bf16.mxu0 %v2457_v53 }
  0x90   :  { %1627 = vmatpush1.bf16.msra.mxu1 %v2545_v25 }
  0x91   :  { %1135 = vmatpush1.bf16.msra.mxu0 %v2455_v56  ;;  %1628 = vmatprep.subr.bf16.mxu1 %v2550_v35  ;;  %v2574_v56 = vld [vmem:[%s3030_s3 + $0xe4] ss:$8 sps:$4 sm:$0xff]  }
  0x92   :  { %1147 = vmatprep.subr.bf16.mxu0 %v2465_v58  ;;  %v2577_v58 = vld [vmem:[%s3030_s3 + $0xf4] ss:$8 sps:$4 sm:$0xff]  }
  0x94   :  { %1137 = vmatmul.mubr.bf16.vlgmr.msra.gmra.mrb[0].mxu0 %v2753_v18  ;;  %v2511_v18 = vld [vmem:[#allocation2 + $0x3dc] ss:$12 sps:$4 sm:$0xff]   ;;  %1629 = vmatpush1.bf16.msra.mxu1 %v2548_v34 }
  0x95   :  { %1148 = vmatpush1.bf16.msra.mxu0 %v2463_v60  ;;  %1179 = vmatprep.mubr.bf16.mxu0 %v2505_v38  ;;  %v2556_v38 = vld [vmem:[%s3030_s3 + $0x84] ss:$8 sps:$4 sm:$0xff]  }
  0x96   :  { %1149 = vmatprep.subr.bf16.mxu0 %v2470_v61  ;;  %1630 = vmatprep.subr.bf16.mxu1 %v2553_v37  ;;  %v2580_v60 = vld [vmem:[%s3030_s3 + $0x104] ss:$8 sps:$4 sm:$0xff]   ;;  %v248_v61 = vlaneseq }
  0x98   :  { %1631 = vmatpush1.bf16.msra.mxu1 %v2551_v36  ;;  %v2866_v62 = vshrl.u32 %v248_v61, 7  ;;  %v2612_v61 = vld [vmem:[%s3032_s5 + $0x50] sm:$0xff]  }
  0x99   :  { %1150 = vmatpush1.bf16.msra.mxu0 %v2468_v0  ;;  %1632 = vmatprep.subr.bf16.mxu1 %v2556_v38  ;;  %v246_v0 = vld [vmem:[%s3029_s2] sm:$0x7] }
  0x9a   :  { %1151 = vmatprep.subr.bf16.mxu0 %v2475_v1  ;;  %v258_v63 = vsub.s32 2, %v2866_v62 }
  0x9c   :  { %1633 = vmatpush1.bf16.msra.mxu1 %v2554_v39  ;;  %v259_v1 = vrot.slane %v246_v0, %v258_v63  ;;  %v2613_v63 = vld [vmem:[%s3032_s5 + $0x58] sm:$0xff]  }
  0x9d   :  { %1152 = vmatpush1.bf16.msra.mxu0 %v2473_v3  ;;  %1634 = vmatprep.subr.bf16.mxu1 %v2559_v40 }
  0x9e   :  { %1153 = vmatprep.subr.bf16.mxu0 %v2480_v4 }
  0xa0   :  { %1635 = vmatpush1.bf16.msra.mxu1 %v2557_v41 }
  0xa1   :  { %1154 = vmatpush1.bf16.msra.mxu0 %v2478_v5  ;;  %1636 = vmatprep.subr.bf16.mxu1 %v2562_v42 }
  0xa2   :  { %1155 = vmatprep.subr.bf16.mxu0 %v2485_v6 }
  0xa4   :  { %1637 = vmatpush1.bf16.msra.mxu1 %v2560_v43 }
  0xa5   :  { %1156 = vmatpush1.bf16.msra.mxu0 %v2483_v7  ;;  %1638 = vmatprep.subr.bf16.mxu1 %v2565_v44 }
  0xa6   :  { %1157 = vmatprep.subr.bf16.mxu0 %v2490_v10 }
  0xa8   :  { %1639 = vmatpush1.bf16.msra.mxu1 %v2563_v45 }
  0xa9   :  { %1158 = vmatpush1.bf16.msra.mxu0 %v2488_v11  ;;  %1640 = vmatprep.subr.bf16.mxu1 %v2568_v46  ;;  %v2578_v46 = vld [vmem:[%s3030_s3 + $0x100] ss:$8 sps:$4 sm:$0xff]  }
  0xaa   :  { %1159 = vmatprep.subr.bf16.mxu0 %v2495_v12  ;;  %v2673_v12 = vmov 0  }
  0xac   :  { %1641 = vmatpush1.bf16.msra.mxu1 %v2566_v47  ;;  %v2583_v47 = vld [vmem:[%s3030_s3 + $0x114] ss:$8 sps:$4 sm:$0xff]  }
  0xad   :  { %1160 = vmatpush1.bf16.msra.mxu0 %v2493_v13  ;;  %1642 = vmatprep.subr.bf16.mxu1 %v2571_v48  ;;  %v2602_v13 = vld [vmem:[%s3032_s5] sm:$0xff]   ;;  %v2581_v48 = vld [vmem:[%s3030_s3 + $0x110] ss:$8 sps:$4 sm:$0xff]  }
  0xae   :  { %1161 = vmatprep.subr.bf16.mxu0 %v2500_v14  ;;  %v2603_v14 = vld [vmem:[%s3032_s5 + $0x8] sm:$0xff]  }
  0xb0   :  { %1643 = vmatpush1.bf16.msra.mxu1 %v2569_v49  ;;  %v2586_v49 = vld [vmem:[%s3030_s3 + $0x124] ss:$8 sps:$4 sm:$0xff]  }
  0xb1   :  { %1162 = vmatpush1.bf16.msra.mxu0 %v2498_v15  ;;  %1644 = vmatprep.subr.bf16.mxu1 %v2574_v56  ;;  %v2604_v15 = vld [vmem:[%s3032_s5 + $0x10] sm:$0xff]  }
  0xb2   :  { %1163 = vmatprep.subr.bf16.mxu0 %v2508_v16  ;;  %v2605_v16 = vld [vmem:[%s3032_s5 + $0x18] sm:$0xff]  }
  0xb3   :  { %v2593_v56 = vld [vmem:[%s3030_s3 + $0x150] ss:$8 sps:$4 sm:$0xff]  }
  0xb4   :  { %1645 = vmatpush1.bf16.msra.mxu1 %v2572_v57  ;;  %v2598_v57 = vld [vmem:[%s3030_s3 + $0x164] ss:$8 sps:$4 sm:$0xff]  }
  0xb5   :  { %1164 = vmatpush1.bf16.msra.mxu0 %v2506_v17  ;;  %1646 = vmatprep.subr.bf16.mxu1 %v2577_v58  ;;  %v2606_v17 = vld [vmem:[%s3032_s5 + $0x20] sm:$0xff]  }
  0xb6   :  { %1165 = vmatprep.subr.bf16.mxu0 %v2511_v18  ;;  %v2596_v58 = vld [vmem:[%s3030_s3 + $0x160] ss:$8 sps:$4 sm:$0xff]  }
  0xb8   :  { %1647 = vmatpush1.bf16.msra.mxu1 %v2575_v59  ;;  %v2601_v59 = vld [vmem:[%s3030_s3 + $0x174] ss:$8 sps:$4 sm:$0xff]  }
  0xb9   :  { %1166 = vmatpush1.bf16.msra.mxu0 %v2509_v19  ;;  %1659 = vmatprep.subr.bf16.mxu1 %v2580_v60  ;;  %v2599_v60 = vld [vmem:[%s3030_s3 + $0x170] ss:$8 sps:$4 sm:$0xff]  }
  0xba   :  { %1167 = vmatprep.subr.bf16.mxu0 %v2514_v20 }
  0xbd   :  { %1168 = vmatpush1.bf16.msra.mxu0 %v2512_v21 }
  0xbe   :  { %1169 = vmatprep.subr.bf16.mxu0 %v2517_v22 }
  0xc1   :  { %1170 = vmatpush1.bf16.msra.mxu0 %v2515_v23  ;;  %v2607_v23 = vld [vmem:[%s3032_s5 + $0x28] sm:$0xff]  }
  0xc2   :  { %1171 = vmatprep.subr.bf16.mxu0 %v2520_v24 }
  0xc5   :  { %1172 = vmatpush1.bf16.msra.mxu0 %v2518_v27  ;;  %v2608_v27 = vld [vmem:[%s3032_s5 + $0x30] sm:$0xff]  }
  0xc6   :  { %1173 = vmatprep.subr.bf16.mxu0 %v2523_v28 }
  0xc9   :  { %1174 = vmatpush1.bf16.msra.mxu0 %v2521_v29  ;;  %v2609_v29 = vld [vmem:[%s3032_s5 + $0x38] sm:$0xff]  }
  0xca   :  { %1175 = vmatprep.subr.bf16.mxu0 %v2526_v30  ;;  %v2610_v30 = vld [vmem:[%s3032_s5 + $0x40] sm:$0xff]  }
  0xcd   :  { %1176 = vmatpush1.bf16.msra.mxu0 %v2524_v31  ;;  %v2611_v31 = vld [vmem:[%s3032_s5 + $0x48] sm:$0xff]  }
  0xce   :  { %1177 = vmatprep.subr.bf16.mxu0 %v2529_v32  ;;  %v250_v32 = vsub.s32 0, %v2866_v62 }
  0xd0   :  { %v251_v34 = vrot.slane %v246_v0, %v250_v32 }
  0xd1   :  { %1178 = vmatpush1.bf16.msra.mxu0 %v2527_v33  ;;  %v254_v33 = vsub.s32 1, %v2866_v62  ;;  %v2621_v62 = vld [vmem:[%s3034_s7 + $0x38] sm:$0xff]  }
  0xd2   :  { %1811 = vmatprep.subr.bf16.mxu0 %v2673_v12 }
  0xd3   :  { %v255_v36 = vrot.slane %v246_v0, %v254_v33  ;;  %v2614_v0 = vld [vmem:[%s3034_s7] sm:$0xff]  }
  0xd4   :  { %1180 = vmatmul.mubr.bf16.vlgmr.msra.gmra.mrb[0].mxu0 %v2765_v52 }
  0xd5   :  { %1812 = vmatpush1.bf16.msra.mxu0 %v2602_v13 }
  0xd6   :  { %1813 = vmatprep.subr.bf16.mxu0 %v2673_v12 }
  0xd9   :  { %1814 = vmatpush1.bf16.msra.mxu0 %v2603_v14 }
  0xda   :  { %1815 = vmatprep.subr.bf16.mxu0 %v2673_v12 }
  0xdd   :  { %1816 = vmatpush1.bf16.msra.mxu0 %v2604_v15 }
  0xde   :  { %1817 = vmatprep.subr.bf16.mxu0 %v2673_v12 }
  0xe1   :  { %1818 = vmatpush1.bf16.msra.mxu0 %v2605_v16 }
  0xe2   :  { %1819 = vmatprep.subr.bf16.mxu0 %v2673_v12 }
  0xe5   :  { %1820 = vmatpush1.bf16.msra.mxu0 %v2606_v17 }
  0xe6   :  { %1821 = vmatprep.subr.bf16.mxu0 %v2673_v12 }
  0xe9   :  { %1822 = vmatpush1.bf16.msra.mxu0 %v2607_v23 }
  0xea   :  { %1823 = vmatprep.subr.bf16.mxu0 %v2673_v12 }
  0xed   :  { %1824 = vmatpush1.bf16.msra.mxu0 %v2608_v27 }
  0xee   :  { %1825 = vmatprep.subr.bf16.mxu0 %v2673_v12 }
  0xf1   :  { %1826 = vmatpush1.bf16.msra.mxu0 %v2609_v29  ;;  %v2196_v29 = vld [vmem:[%s3035_s8] ss:$0 sm:$0xff] }
  0xf2   :  { %1827 = vmatprep.subr.bf16.mxu0 %v2673_v12 }
  0xf5   :  { %1828 = vmatpush1.bf16.msra.mxu0 %v2610_v30 }
  0xf6   :  { %1829 = vmatprep.subr.bf16.mxu0 %v2673_v12 }
  0xf9   :  { %1830 = vmatpush1.bf16.msra.mxu0 %v2611_v31 }
  0xfa   :  { %1831 = vmatprep.subr.bf16.mxu0 %v2673_v12 }
  0xfd   :  { %1832 = vmatpush1.bf16.msra.mxu0 %v2612_v61 }
  0xfe   :  { %1833 = vmatprep.subr.bf16.mxu0 %v2673_v12 }
 0x101   :  { %1834 = vmatpush1.bf16.msra.mxu0 %v2613_v63 }
 0x10e   :  { %v2221_v50 = vpop.f32.mrb[0].mxu1 }
 0x10f   :  { %v2222_v51 = vpop.f32.mrb[1].mxu1 }
 0x110   :  { %v2223_v52 = vadd.f32 %v2222_v51, %v2221_v50  ;;  %v2224_v53 = vpop.f32.mrb[2].mxu1  ;;  %v2584_v50 = vld [vmem:[%s3030_s3 + $0x120] ss:$8 sps:$4 sm:$0xff]   ;;  %v2589_v51 = vld [vmem:[%s3030_s3 + $0x134] ss:$8 sps:$4 sm:$0xff]  }
 0x111   :  { %v2225_v54 = vpop.f32.mrb[3].mxu1 }
 0x112   :  { %v2226_v55 = vadd.f32 %v2225_v54, %v2224_v53  ;;  %v1225_v2 = vadd.f32 %v2223_v52, %v259_v1  ;;  %v2587_v52 = vld [vmem:[%s3030_s3 + $0x130] ss:$8 sps:$4 sm:$0xff]   ;;  %v2592_v53 = vld [vmem:[%s3030_s3 + $0x144] ss:$8 sps:$4 sm:$0xff]   ;;  %v2590_v54 = vld [vmem:[%s3030_s3 + $0x140] ss:$8 sps:$4 sm:$0xff]  }
 0x114   :  { %v1228_v5 = vadd.f32 %v2226_v55, %v259_v1  ;;  %v2595_v55 = vld [vmem:[%s3030_s3 + $0x154] ss:$8 sps:$4 sm:$0xff]   ;;  %v2674_v1 = vmov 0.0  }
 0x12e   :  { %v2243_v3 = vpop.f32.mrb[4].mxu1 }
 0x12f   :  { %v2244_v4 = vpop.f32.mrb[5].mxu1 }
 0x130   :  { %v2245_v6 = vadd.f32 %v2244_v4, %v2243_v3  ;;  %v2246_v7 = vpop.f32.mrb[6].mxu1  ;;  %v2616_v3 = vld [vmem:[%s3034_s7 + $0x10] sm:$0xff]   ;;  %v2617_v4 = vld [vmem:[%s3034_s7 + $0x18] sm:$0xff]  }
 0x131   :  { %v2247_v8 = vpop.f32.mrb[7].mxu1 }
 0x132   :  { %v1266_v9 = vadd.f32 %v2245_v6, %v1225_v2  ;;  %v2248_v10 = vadd.f32 %v2247_v8, %v2246_v7  ;;  %v2615_v2 = vld [vmem:[%s3034_s7 + $0x8] sm:$0xff]   ;;  %v1364_v7 = vld [vmem:[%s3031_s4] sm:$0x3] }
 0x133   :  { %v2619_v6 = vld [vmem:[%s3034_s7 + $0x28] sm:$0xff]   ;;  %v1369_v8 = vrot.slane %v1364_v7, %v250_v32 }
 0x134   :  { %v1269_v11 = vadd.f32 %v2248_v10, %v1228_v5  ;;  %v2618_v5 = vld [vmem:[%s3034_s7 + $0x20] sm:$0xff]   ;;  %v1373_v10 = vrot.slane %v1364_v7, %v254_v33 }
 0x14e   :  { %v2265_v18 = vpop.f32.mrb[8].mxu1 }
 0x14f   :  { %v2266_v19 = vpop.f32.mrb[9].mxu1 }
 0x150   :  { %v2267_v20 = vadd.f32 %v2266_v19, %v2265_v18  ;;  %v2268_v21 = vpop.f32.mrb[10].mxu1 }
 0x151   :  { %v2269_v22 = vpop.f32.mrb[11].mxu1 }
 0x152   :  { %v2895_v24 = vadd.f32 %v2267_v20, %v1266_v9  ;;  %v2270_v25 = vadd.f32 %v2269_v22, %v2268_v21  ;;  %v2620_v20 = vld [vmem:[%s3034_s7 + $0x30] sm:$0xff]   ;;  %v2182_v21 = vld [vmem:[%s3033_s6] ss:$0 sm:$0xff]  ;;  %s2676_s7 = smov [#allocation5]  }
 0x153   :  { %s1972_s13 = sshll.u32 %s2676_s7, 4  ;;  %s1973_s13 = int_to_ptr.vmem [resolvable:$true] %s1972_s13 }
 0x154   :  { %v2898_v26 = vadd.f32 %v2270_v25, %v1269_v11  ;;  %s2644_s6 = scalar_lea.vmem %s1973_s13, 256  ;;  %p2649_p9 = scmp.lt.s32.totalorder %s1973_s13, %s1973_s13 }
 0x155   :  { %p2645_p8 = scmp.ne.s32.totalorder %s1973_s13, %s2644_s6  ;;  %p2650_p10 = scmp.lt.s32.totalorder %s2644_s6, %s2644_s6 }
 0x156   :  { %v1315_v28 = vpack.c.bf16 %v2898_v26, %v2895_v24 }
 0x157   :  { %p2651_p11 = por %p2650_p10, %p2649_p9 }
 0x159   :  { %p2652_p12 = pnand %p2651_p11, %p2645_p8 }
 0x1a7   :  { %v1181_v35 = vpop.f32.mrb[0].mxu0 }
 0x1a8   :  { %v1183_v37 = vpop.f32.mrb[1].mxu0  ;;  %v2300_v39 = vadd.f32 %v1181_v35, %v251_v34 }
 0x1a9   :  { %v1185_v38 = vpop.f32.mrb[2].mxu0  ;;  %v2301_v42 = vadd.f32 %v1183_v37, %v255_v36 }
 0x1aa   :  { %v2302_v40 = vadd.f32 %v1185_v38, %v251_v34  ;;  %v1187_v41 = vpop.f32.mrb[3].mxu0 }
 0x1ab   :  { %v2303_v43 = vadd.f32 %v1187_v41, %v255_v36 }
 0x1ac   :  { %v1313_v44 = vpack.c.bf16 %v2302_v40, %v2300_v39 }
 0x1ad   :  { %v1314_v45 = vpack.c.bf16 %v2303_v43, %v2301_v42 }
 0x1af   :  { %1648 = vmatprep.mubr.bf16.mxu1 %v1314_v45 }
 0x1b0   :  { %1649 = vmatmul.mubr.bf16.vlgmr.msra.gmra.mrb[12].mxu1 %v1313_v44 }
 0x1b1   :  { %1660 = vmatpush1.bf16.msra.mxu1 %v2578_v46  ;;  %1691 = vmatprep.mubr.bf16.mxu1 %v2673_v12 }
 0x1b2   :  { %1661 = vmatprep.subr.bf16.mxu1 %v2583_v47 }
 0x1b5   :  { %1662 = vmatpush1.bf16.msra.mxu1 %v2581_v48 }
 0x1b6   :  { %1663 = vmatprep.subr.bf16.mxu1 %v2586_v49 }
 0x1b9   :  { %1664 = vmatpush1.bf16.msra.mxu1 %v2584_v50 }
 0x1ba   :  { %1665 = vmatprep.subr.bf16.mxu1 %v2589_v51 }
 0x1bd   :  { %1666 = vmatpush1.bf16.msra.mxu1 %v2587_v52 }
 0x1be   :  { %1667 = vmatprep.subr.bf16.mxu1 %v2592_v53 }
 0x1c1   :  { %1668 = vmatpush1.bf16.msra.mxu1 %v2590_v54 }
 0x1c2   :  { %1669 = vmatprep.subr.bf16.mxu1 %v2595_v55 }
 0x1c5   :  { %1670 = vmatpush1.bf16.msra.mxu1 %v2593_v56 }
 0x1c6   :  { %1671 = vmatprep.subr.bf16.mxu1 %v2598_v57 }
 0x1c9   :  { %1672 = vmatpush1.bf16.msra.mxu1 %v2596_v58 }
 0x1ca   :  { %1673 = vmatprep.subr.bf16.mxu1 %v2601_v59 }
 0x1cd   :  { %1674 = vmatpush1.bf16.msra.mxu1 %v2599_v60 }
 0x1ce   :  { %2280 = vmatprep.subr.bf16.mxu1 %v2674_v1 }
 0x1d0   :  { %1692 = vmatmul.mubr.bf16.vlgmr.msra.gmra.mrb[12].mxu1 %v1315_v28 }
 0x1d1   :  { %2281 = vmatpush3.bf16.msra.mxu1 %v2614_v0  ;;  %2296 = vmatprep.mubr.msk.bf16.mxu1 %vm2675_vm1, %v2674_v1 }
 0x1d2   :  { %2282 = vmatprep.subr.bf16.mxu1 %v2674_v1 }
 0x1d5   :  { %2283 = vmatpush3.bf16.msra.mxu1 %v2615_v2 }
 0x1d6   :  { %2284 = vmatprep.subr.bf16.mxu1 %v2674_v1 }
 0x1d9   :  { %2285 = vmatpush3.bf16.msra.mxu1 %v2616_v3 }
 0x1da   :  { %2286 = vmatprep.subr.bf16.mxu1 %v2674_v1 }
 0x1dd   :  { %2287 = vmatpush3.bf16.msra.mxu1 %v2617_v4 }
 0x1de   :  { %2288 = vmatprep.subr.bf16.mxu1 %v2674_v1 }
 0x1e1   :  { %2289 = vmatpush3.bf16.msra.mxu1 %v2618_v5 }
 0x1e2   :  { %2290 = vmatprep.subr.bf16.mxu1 %v2674_v1 }
 0x1e5   :  { %2291 = vmatpush3.bf16.msra.mxu1 %v2619_v6 }
 0x1e6   :  { %2292 = vmatprep.subr.bf16.mxu1 %v2674_v1 }
 0x1e9   :  { %2293 = vmatpush3.bf16.msra.mxu1 %v2620_v20 }
 0x1ea   :  { %2294 = vmatprep.subr.bf16.mxu1 %v2674_v1 }
 0x1ed   :  { %2295 = vmatpush3.bf16.msra.mxu1 %v2621_v62 }
 0x2a3   :  { %v1693_v9 = vpop.f32.mrb[12].mxu1 }
 0x2a4   :  { %v1695_v11 = vpop.f32.mrb[13].mxu1  ;;  %v2304_v13 = vadd.f32 %v1693_v9, %v1369_v8 }
 0x2a5   :  { %v1697_v12 = vpop.f32.mrb[14].mxu1  ;;  %v2305_v16 = vadd.f32 %v1695_v11, %v1373_v10 }
 0x2a6   :  { %v2306_v14 = vadd.f32 %v1697_v12, %v1369_v8  ;;  %v1699_v15 = vpop.f32.mrb[15].mxu1 }
 0x2a7   :  { %v2307_v17 = vadd.f32 %v1699_v15, %v1373_v10 }
 0x2a8   :  { %v1702_v18 = vpack.c.bf16 %v2306_v14, %v2304_v13 }
 0x2a9   :  { %v1703_v19 = vpack.c.bf16 %v2307_v17, %v2305_v16 }
 0x2ab   :  { %2195 = vmatprep.mubr.msk.bf16.mxu0 %vm1807_vm0, %v1703_v19 }
 0x2ac   :  { %1844 = vmatmul.mubr.bf16.vlgmr.msra.gmra.mrb[4].mxu0 %v1702_v18 }
 0x37f   :  { %v1845_v22 = vpop.f32.mrb[4].mxu0 }
 0x380   :  { %v1847_v23 = vpop.f32.mrb[5].mxu0  ;;  %v1846_v25 = vadd.f32 %v2182_v21, %v1845_v22 }
 0x381   :  { %v1848_v24 = vpop.f32.mrb[6].mxu0 }
 0x382   :  { %v1849_v26 = vadd.f32 %v2182_v21, %v1848_v24  ;;  %v1850_v27 = vpop.f32.mrb[7].mxu0 }
 0x384   :  { %v1852_v28 = vpack.c.bf16 %v1849_v26, %v1846_v25 }
 0x386   :  { %2297 = vmatmul.mubr.bf16.vlgmr.msra.gmra.mrb[16].mxu1 %v1852_v28 }
 0x459   :  { %v1958_v30 = vpop.f32.mrb[16].mxu1 }
 0x45a   :  { %v1959_v31 = vadd.f32 %v2196_v29, %v1958_v30  ;;  %v2298_v32 = vpop.f32.mrb[17].mxu1 }
 0x45b   :  { %v1961_v33 = vpop.f32.mrb[18].mxu1 }
 0x45c   :  { %1965 = vst [vmem:[#allocation5] sm:$0xff] %v1959_v31  ;;  %v1962_v34 = vadd.f32 %v2196_v29, %v1961_v33  ;;  %v2299_v35 = vpop.f32.mrb[19].mxu1 }
 0x45e   :  { %1966 = vst [vmem:[#allocation5 + $0x8] sm:$0xff] %v1962_v34 }
 0x45f   :  { %2655 = shalt.err (!%p2652_p12)
}
 0x460   :  { %s2656_s14 = scalar_lea.hbm %s3036_s9, 256 }
 0x461   :  { %p2657_p13 = scmp.ne.s32.totalorder %s3036_s9, %s2656_s14  ;;  %p2660_p0 = scmp.lt.u32.totalorder %s2656_s14, %s3036_s9 }
 0x463   :  { %p2662_p1 = pnand %p2660_p0, %p2657_p13 }
 0x465   :  { %2665 = shalt.err (!%p2662_p1)
}
 0x466   :  { %s2677_s3 = smov 128   ;;  %s2678_s19 = smov 8  }
 0x467   :  { %1978 = dma.vmem_to_hbm [thread:$0]  %s1973_s13, 256, %s3036_s9, [#allocation4], %s2677_s3, %s2677_s3, %s2678_s19  }
 0x468   :  { %2668 = dma.done.wait [#allocation4], 256  }
 0x469   :  { %2669 = vsyncadd [#allocation4], 4294967040 }
 0x46a   :  { %1982 = vsyncpa [#allocation3], 1 }
 0x46b   :  { %1983 = vsyncpa [#allocation4], 1 }

</bundles_post_ra>
